<compile_context>
chip_gen: v7x
topology: tpu7x:2x2x1
jax: 0.10.0
libtpu: 0.0.40
codegen_flags: <defaults>
</compile_context>

<pallas_src>
import jax
import jax.numpy as jnp
from jax import lax
from jax.experimental import pallas as pl
from jax.experimental.pallas import tpu as pltpu


def build_glacier_dynamics(Z_topo, ice_mask, *, ttot, rho, g, fd, Lx, Ly, dx, dy,
                           dtmax, t_freq=5.0, lapse_rate=0.0065, melt_factor=0.5):
    """Returns a jitted forward(precip, T_ma_lowest, T_mj_lowest) -> H_ice (ny, nx)."""
    nx = int(Lx / dx)
    ny = int(Ly / dy)
    assert Z_topo.shape == (ny, nx) and ice_mask.shape == (ny, nx)

    # lane / sublane padding: last dim -> multiple of 128, second-to-last -> 8
    nx_p = 128 * pl.cdiv(nx, 128)
    ny_p = 8 * pl.cdiv(ny, 8)

    eps = 1e-10
    fd_rg3 = float(fd * (rho * g) ** 3.0)          # compile-time constant
    inv_dx = float(1.0 / dx)
    inv_dy = float(1.0 / dy)
    min_d2_over_cfl = float(min(dx, dy) ** 2 / 2.7)
    dtmax_f = float(dtmax)
    ttot_f = float(ttot)
    t_freq_f = float(t_freq)

    def shift_xp(a):   # a[j, i+1] placed at [j, i]  (wrapped column masked later)
        return jnp.roll(a, -1, axis=1)

    def shift_yp(a):   # a[j+1, i] placed at [j, i]  (wrapped row masked later)
        return jnp.roll(a, -1, axis=0)

    # ------------- loop-invariant fields, built once on the host -------------
    def pad_field(a):
        return jnp.zeros((ny_p, nx_p), jnp.float32).at[:ny, :nx].set(
            jnp.asarray(a, jnp.float32))

    rr = jnp.arange(ny_p, dtype=jnp.int32)[:, None]
    cc = jnp.arange(nx_p, dtype=jnp.int32)[None, :]
    stag_mask = ((rr < ny - 1) & (cc < nx - 1)).astype(jnp.float32)
    interior_mask = ((rr >= 1) & (rr < ny - 1) &
                     (cc >= 1) & (cc < nx - 1)).astype(jnp.float32)

    Z_topo_p = pad_field(Z_topo)
    mask_p = pad_field(ice_mask)

    # ------------------- single fused time-loop kernel -------------------
    def fused_kernel(z_topo_ref, precip_ref, mask_ref, stag_ref, intr_ref,
                     tma_ref, tmj_ref, h_out_ref, zsurf_ref, smb_ref, tcar_ref):
        # TODO(synk): `update_smb` is not defined in the reference source; a
        # representative lapse-rate accumulation/ablation SMB is implemented here.
        def compute_smb(Z):
            t_ma = tma_ref[0, 0] - lapse_rate * Z        # annual-mean T at elevation
            t_mj = tmj_ref[0, 0] - lapse_rate * Z        # july-mean T at elevation
            accum = jnp.where(t_ma <= 0.0, precip_ref[...], 0.0)
            melt = melt_factor * jnp.maximum(t_mj, 0.0)
            return (accum - melt) * mask_ref[...]

        # ---- state init: H = 0, Z_surf = topo, initial SMB ----
        h_out_ref[...] = jnp.zeros((ny_p, nx_p), jnp.float32)
        zsurf_ref[...] = z_topo_ref[...]
        smb_ref[...] = compute_smb(z_topo_ref[...])

        def step(time, t_last):
            H = h_out_ref[...]
            Z = zsurf_ref[...]
            smb = smb_ref[...]

            # ice thickness on the staggered grid: 2 rolls
            tH = H + shift_xp(H)
            H_avg = 0.25 * (tH + shift_yp(tH))

            # surface slope differences, each bound once and reused: 3 rolls
            Zx = shift_xp(Z)
            Zy = shift_yp(Z)
            Zxy = shift_xp(Zy)
            dZx = Zx - Z          # Z[j, i+1] - Z[j, i]
            dZy = Zy - Z          # Z[j+1, i] - Z[j, i]
            dZx_y = Zxy - Zy      # Z[j+1, i+1] - Z[j+1, i]
            dZy_x = Zxy - Zx      # Z[j+1, i+1] - Z[j, i+1]
            Sx = (0.5 * inv_dx) * (dZx + dZx_y)
            Sy = (0.5 * inv_dy) * (dZy + dZy_x)
            S2 = Sx * Sx + Sy * Sy + eps                 # == Snorm**2 (sqrt removed)

            H_avg2 = H_avg * H_avg
            D = fd_rg3 * (H_avg2 * H_avg2 * H_avg) * S2 + eps

            # adaptive CFL step: global max over valid staggered cells; dt is
            # only consumed by the final axpy, so the reduce stays overlappable
            # with the flux computation below.
            d_max = jnp.max(D * stag_ref[...])
            dt = jnp.minimum(min_d2_over_cfl / d_max, dtmax_f)

            Dx = shift_xp(D)
            Dy = shift_yp(D)
            qx = (-0.5 * inv_dx) * (D + Dy) * dZx_y
            qy = (-0.5 * inv_dy) * (D + Dx) * dZy_x

            # flux divergence formed directly at cell centers:
            #   dHdt_c[j,i] = -((qx[j-1,i]-qx[j-1,i-1])/dx + (qy[j,i-1]-qy[j-1,i-1])/dy)
            qx_dx = qx - jnp.roll(qx, 1, axis=1)
            qy_dy = qy - jnp.roll(qy, 1, axis=0)
            dHdt_c = -(jnp.roll(qx_dx, 1, axis=0) * inv_dx +
                       jnp.roll(qy_dy, 1, axis=1) * inv_dy)

            # boundary / padding cells keep H unchanged (they stay 0)
            H_new = jnp.maximum(H + intr_ref[...] * (dt * (dHdt_c + smb)), 0.0)
            Z_new = z_topo_ref[...] + H_new

            # full-tile, unmasked stores (state stays VMEM-resident)
            h_out_ref[...] = H_new
            zsurf_ref[...] = Z_new

            time_new = time + dt
            do_upd = (time_new - t_last) >= t_freq_f

            @pl.when(do_upd)
            def _():
                smb_ref[...] = compute_smb(Z_new)

            t_last_new = jnp.where(do_upd, time_new, t_last)
            return time_new, t_last_new

        def cond_fn(carry):
            return carry[0] < ttot_f

        def body_fn(carry):
            # 2x unrolled body: the second physical step is guarded so semantics
            # match the reference's per-step `while time < ttot` check exactly;
            # the guarded step's scalar carry goes through SMEM scratch.
            time0, tl0 = carry
            time1, tl1 = step(time0, tl0)
            tcar_ref[0] = time1
            tcar_ref[1] = tl1

            @pl.when(time1 < ttot_f)
            def _():
                time2, tl2 = step(time1, tl1)
                tcar_ref[0] = time2
                tcar_ref[1] = tl2

            return (tcar_ref[0], tcar_ref[1])

        lax.while_loop(cond_fn, body_fn, (jnp.float32(0.0), jnp.float32(0.0)))

    # --------------------- per-generation VMEM sizing ---------------------
    field_bytes = ny_p * nx_p * 4
    try:
        vmem_cap = int(getattr(pltpu.get_tpu_info(), "vmem_capacity_bytes",
                               64 << 20))
    except Exception:  # no TPU info available at build time
        vmem_cap = 64 << 20
    # ~8 persistent full fields + live temporaries + Mosaic internal headroom
    need = 32 * field_bytes
    vmem_limit = int(min(max(32 << 20, need), int(0.85 * vmem_cap), 100 << 20))
    # TODO(synk): domains whose working set exceeds vmem_limit need a strip-tiled
    # (8-row halo) step, and on v7x the second TensorCore could take half the
    # rows via pl.core_map; both are omitted here (single-core, whole-field).

    fused_call = pl.pallas_call(
        fused_kernel,
        out_shape=jax.ShapeDtypeStruct((ny_p, nx_p), jnp.float32),    # H_ice (padded)
        in_specs=[pl.BlockSpec(memory_space=pltpu.MemorySpace.VMEM),  # Z_topo
                  pl.BlockSpec(memory_space=pltpu.MemorySpace.VMEM),  # precip
                  pl.BlockSpec(memory_space=pltpu.MemorySpace.VMEM),  # ice mask
                  pl.BlockSpec(memory_space=pltpu.MemorySpace.VMEM),  # staggered-valid mask
                  pl.BlockSpec(memory_space=pltpu.MemorySpace.VMEM),  # interior mask
                  pl.BlockSpec(memory_space=pltpu.MemorySpace.SMEM),  # T_ma (1,1)
                  pl.BlockSpec(memory_space=pltpu.MemorySpace.SMEM)], # T_mj (1,1)
        out_specs=pl.BlockSpec(memory_space=pltpu.MemorySpace.VMEM),
        scratch_shapes=[pltpu.VMEM((ny_p, nx_p), jnp.float32),   # Z_surf state
                        pltpu.VMEM((ny_p, nx_p), jnp.float32),   # SMB state
                        pltpu.SMEM((2,), jnp.float32)],          # (time, t_last) stash
        compiler_params=pltpu.CompilerParams(vmem_limit_bytes=vmem_limit),
    )

    # TODO(synk): torch.utils.checkpoint only changes backward-pass memory; the
    # forward semantics are identical, so it is omitted (this while_loop kernel
    # is forward-only and not reverse-differentiable).
    @jax.jit
    def forward(precip_tensor, T_ma_lowest, T_mj_lowest):
        precip_p = jnp.zeros((ny_p, nx_p), jnp.float32).at[:ny, :nx].set(
            jnp.asarray(precip_tensor, jnp.float32))
        tma = jnp.asarray(T_ma_lowest, jnp.float32).reshape(1, 1)
        tmj = jnp.asarray(T_mj_lowest, jnp.float32).reshape(1, 1)
        H_p = fused_call(Z_topo_p, precip_p, mask_p, stag_mask, interior_mask,
                         tma, tmj)
        return H_p[:ny, :nx]

    return forward


if __name__ == "__main__":
    key = jax.random.PRNGKey(0)
    k_topo, k_precip = jax.random.split(key)

    dx = dy = 100.0
    nx = ny = 32
    Lx, Ly = nx * dx, ny * dy

    # deterministic smooth mountain + small noise
    yy = jnp.arange(ny, dtype=jnp.float32)[:, None]
    xx = jnp.arange(nx, dtype=jnp.float32)[None, :]
    cy, cx = (ny - 1) / 2.0, (nx - 1) / 2.0
    Z_topo = 3000.0 * jnp.exp(-(((yy - cy) / 10.0) ** 2 + ((xx - cx) / 10.0) ** 2))
    Z_topo = (Z_topo + 20.0 * jax.random.uniform(k_topo, (ny, nx))).astype(jnp.float32)
    ice_mask = jnp.ones((ny, nx), jnp.float32)

    precip = (0.5 + 1.5 * jax.random.uniform(k_precip, (ny, nx))).astype(jnp.float32)
    T_ma_lowest = jnp.float32(2.0)     # deg C at lowest elevation
    T_mj_lowest = jnp.float32(12.0)

    forward = build_glacier_dynamics(
        Z_topo, ice_mask,
        ttot=20.0, rho=910.0, g=9.81, fd=4.0e-17,
        Lx=Lx, Ly=Ly, dx=dx, dy=dy, dtmax=1.0)

    H_ice = forward(precip, T_ma_lowest, T_mj_lowest)
    H_ice = jax.block_until_ready(H_ice)
    assert H_ice.shape == (ny, nx)
    assert bool(jnp.all(jnp.isfinite(H_ice)))
    print("KERNEL_OK")
</pallas_src>

<mosaic_0001>
module attributes {stable_mosaic.version = 11 : i64} {
  func.func @fused_kernel(%arg0: memref<32x128xf32, #tpu.memory_space<vmem>>, %arg1: memref<32x128xf32, #tpu.memory_space<vmem>>, %arg2: memref<32x128xf32, #tpu.memory_space<vmem>>, %arg3: memref<32x128xf32, #tpu.memory_space<vmem>>, %arg4: memref<32x128xf32, #tpu.memory_space<vmem>>, %arg5: memref<1x1xf32, #tpu.memory_space<smem>>, %arg6: memref<1x1xf32, #tpu.memory_space<smem>>, %arg7: memref<32x128xf32, #tpu.memory_space<vmem>>, %arg8: memref<32x128xf32, #tpu.memory_space<vmem>>, %arg9: memref<32x128xf32, #tpu.memory_space<vmem>>, %arg10: memref<2xf32, #tpu.memory_space<smem>>) attributes {dimension_semantics = [], scalar_prefetch = 0 : i64, scratch_operands = 3 : i64, tpu.core_type = #tpu.core_type<tc>} {
    %cst = arith.constant 0.000000e+00 : f32
    %0 = vector.broadcast %cst : f32 to vector<32x128xf32>
    %c0 = arith.constant 0 : index
    %c0_0 = arith.constant 0 : index
    %1 = vector.load %arg7[%c0, %c0_0] : memref<32x128xf32, #tpu.memory_space<vmem>>, vector<32x128xf32>
    tpu.vector_store %arg7[%c0, %c0_0], %0 {strides = array<i32>} : memref<32x128xf32, #tpu.memory_space<vmem>>, vector<32x128xf32>,
    %c0_1 = arith.constant 0 : index
    %c0_2 = arith.constant 0 : index
    %2 = vector.load %arg0[%c0_1, %c0_2] : memref<32x128xf32, #tpu.memory_space<vmem>>, vector<32x128xf32>
    %c0_3 = arith.constant 0 : index
    %c0_4 = arith.constant 0 : index
    %3 = vector.load %arg8[%c0_3, %c0_4] : memref<32x128xf32, #tpu.memory_space<vmem>>, vector<32x128xf32>
    tpu.vector_store %arg8[%c0_3, %c0_4], %2 {strides = array<i32>} : memref<32x128xf32, #tpu.memory_space<vmem>>, vector<32x128xf32>,
    %c0_5 = arith.constant 0 : index
    %c0_6 = arith.constant 0 : index
    %4 = vector.load %arg0[%c0_5, %c0_6] : memref<32x128xf32, #tpu.memory_space<vmem>>, vector<32x128xf32>
    %c0_7 = arith.constant 0 : index
    %c0_8 = arith.constant 0 : index
    %5 = memref.load %arg5[%c0_7, %c0_8] : memref<1x1xf32, #tpu.memory_space<smem>>
    %cst_9 = arith.constant 6.500000e-03 : f32
    %6 = vector.broadcast %cst_9 : f32 to vector<32x128xf32>
    %7 = arith.mulf %6, %4 : vector<32x128xf32>
    %8 = vector.broadcast %5 : f32 to vector<32x128xf32>
    %9 = arith.subf %8, %7 : vector<32x128xf32>
    %c0_10 = arith.constant 0 : index
    %c0_11 = arith.constant 0 : index
    %10 = memref.load %arg6[%c0_10, %c0_11] : memref<1x1xf32, #tpu.memory_space<smem>>
    %cst_12 = arith.constant 6.500000e-03 : f32
    %11 = vector.broadcast %cst_12 : f32 to vector<32x128xf32>
    %12 = arith.mulf %11, %4 : vector<32x128xf32>
    %13 = vector.broadcast %10 : f32 to vector<32x128xf32>
    %14 = arith.subf %13, %12 : vector<32x128xf32>
    %cst_13 = arith.constant 0.000000e+00 : f32
    %15 = vector.broadcast %cst_13 : f32 to vector<32x128xf32>
    %16 = arith.cmpf ole, %9, %15 : vector<32x128xf32>
    %c0_14 = arith.constant 0 : index
    %c0_15 = arith.constant 0 : index
    %17 = vector.load %arg1[%c0_14, %c0_15] : memref<32x128xf32, #tpu.memory_space<vmem>>, vector<32x128xf32>
    %cst_16 = arith.constant 0.000000e+00 : f32
    %18 = vector.broadcast %cst_16 : f32 to vector<32x128xf32>
    %19 = arith.select %16, %17, %18 : vector<32x128xi1>, vector<32x128xf32>
    %cst_17 = arith.constant 0.000000e+00 : f32
    %20 = vector.broadcast %cst_17 : f32 to vector<32x128xf32>
    %21 = arith.maximumf %14, %20 : vector<32x128xf32>
    %cst_18 = arith.constant 5.000000e-01 : f32
    %22 = vector.broadcast %cst_18 : f32 to vector<32x128xf32>
    %23 = arith.mulf %22, %21 : vector<32x128xf32>
    %24 = arith.subf %19, %23 : vector<32x128xf32>
    %c0_19 = arith.constant 0 : index
    %c0_20 = arith.constant 0 : index
    %25 = vector.load %arg2[%c0_19, %c0_20] : memref<32x128xf32, #tpu.memory_space<vmem>>, vector<32x128xf32>
    %26 = arith.mulf %24, %25 : vector<32x128xf32>
    %c0_21 = arith.constant 0 : index
    %c0_22 = arith.constant 0 : index
    %27 = vector.load %arg9[%c0_21, %c0_22] : memref<32x128xf32, #tpu.memory_space<vmem>>, vector<32x128xf32>
    tpu.vector_store %arg9[%c0_21, %c0_22], %26 {strides = array<i32>} : memref<32x128xf32, #tpu.memory_space<vmem>>, vector<32x128xf32>,
    %cst_23 = arith.constant 0.000000e+00 : f32
    %cst_24 = arith.constant 0.000000e+00 : f32
    %28:2 = scf.while (%arg11 = %cst_23, %arg12 = %cst_24) : (f32, f32) -> (f32, f32) {
      %cst_25 = arith.constant 2.000000e+01 : f32
      %29 = arith.cmpf olt, %arg11, %cst_25 : f32
      scf.condition(%29) %arg11, %arg12 : f32, f32
    } do {
    ^bb0(%arg11: f32, %arg12: f32):
      %c0_25 = arith.constant 0 : index
      %c0_26 = arith.constant 0 : index
      %29 = vector.load %arg7[%c0_25, %c0_26] : memref<32x128xf32, #tpu.memory_space<vmem>>, vector<32x128xf32>
      %c0_27 = arith.constant 0 : index
      %c0_28 = arith.constant 0 : index
      %30 = vector.load %arg8[%c0_27, %c0_28] : memref<32x128xf32, #tpu.memory_space<vmem>>, vector<32x128xf32>
      %c0_29 = arith.constant 0 : index
      %c0_30 = arith.constant 0 : index
      %31 = vector.load %arg9[%c0_29, %c0_30] : memref<32x128xf32, #tpu.memory_space<vmem>>, vector<32x128xf32>
      %32 = vector.extract_strided_slice %29 {offsets = [0, 1], sizes = [32, 127], strides = [1, 1]} : vector<32x128xf32> to vector<32x127xf32>
      %33 = vector.extract_strided_slice %29 {offsets = [0, 0], sizes = [32, 1], strides = [1, 1]} : vector<32x128xf32> to vector<32x1xf32>
      %34 = tpu.concatenate %32, %33 in 1 : vector<32x127xf32>, vector<32x1xf32> -> vector<32x128xf32>
      %35 = arith.addf %29, %34 : vector<32x128xf32>
      %36 = vector.extract_strided_slice %35 {offsets = [1, 0], sizes = [31, 128], strides = [1, 1]} : vector<32x128xf32> to vector<31x128xf32>
      %37 = vector.extract_strided_slice %35 {offsets = [0, 0], sizes = [1, 128], strides = [1, 1]} : vector<32x128xf32> to vector<1x128xf32>
      %38 = tpu.concatenate %36, %37 in 0 : vector<31x128xf32>, vector<1x128xf32> -> vector<32x128xf32>
      %39 = arith.addf %35, %38 : vector<32x128xf32>
      %cst_31 = arith.constant 2.500000e-01 : f32
      %40 = vector.broadcast %cst_31 : f32 to vector<32x128xf32>
      %41 = arith.mulf %40, %39 : vector<32x128xf32>
      %42 = vector.extract_strided_slice %30 {offsets = [0, 1], sizes = [32, 127], strides = [1, 1]} : vector<32x128xf32> to vector<32x127xf32>
      %43 = vector.extract_strided_slice %30 {offsets = [0, 0], sizes = [32, 1], strides = [1, 1]} : vector<32x128xf32> to vector<32x1xf32>
      %44 = tpu.concatenate %42, %43 in 1 : vector<32x127xf32>, vector<32x1xf32> -> vector<32x128xf32>
      %45 = vector.extract_strided_slice %30 {offsets = [1, 0], sizes = [31, 128], strides = [1, 1]} : vector<32x128xf32> to vector<31x128xf32>
      %46 = vector.extract_strided_slice %30 {offsets = [0, 0], sizes = [1, 128], strides = [1, 1]} : vector<32x128xf32> to vector<1x128xf32>
      %47 = tpu.concatenate %45, %46 in 0 : vector<31x128xf32>, vector<1x128xf32> -> vector<32x128xf32>
      %48 = vector.extract_strided_slice %47 {offsets = [0, 1], sizes = [32, 127], strides = [1, 1]} : vector<32x128xf32> to vector<32x127xf32>
      %49 = vector.extract_strided_slice %47 {offsets = [0, 0], sizes = [32, 1], strides = [1, 1]} : vector<32x128xf32> to vector<32x1xf32>
      %50 = tpu.concatenate %48, %49 in 1 : vector<32x127xf32>, vector<32x1xf32> -> vector<32x128xf32>
      %51 = arith.subf %44, %30 : vector<32x128xf32>
      %52 = arith.subf %47, %30 : vector<32x128xf32>
      %53 = arith.subf %50, %47 : vector<32x128xf32>
      %54 = arith.subf %50, %44 : vector<32x128xf32>
      %55 = arith.addf %51, %53 : vector<32x128xf32>
      %cst_32 = arith.constant 5.000000e-03 : f32
      %56 = vector.broadcast %cst_32 : f32 to vector<32x128xf32>
      %57 = arith.mulf %56, %55 : vector<32x128xf32>
      %58 = arith.addf %52, %54 : vector<32x128xf32>
      %cst_33 = arith.constant 5.000000e-03 : f32
      %59 = vector.broadcast %cst_33 : f32 to vector<32x128xf32>
      %60 = arith.mulf %59, %58 : vector<32x128xf32>
      %61 = arith.mulf %57, %57 : vector<32x128xf32>
      %62 = arith.mulf %60, %60 : vector<32x128xf32>
      %63 = arith.addf %61, %62 : vector<32x128xf32>
      %cst_34 = arith.constant 1.000000e-10 : f32
      %64 = vector.broadcast %cst_34 : f32 to vector<32x128xf32>
      %65 = arith.addf %63, %64 : vector<32x128xf32>
      %66 = arith.mulf %41, %41 : vector<32x128xf32>
      %67 = arith.mulf %66, %66 : vector<32x128xf32>
      %68 = arith.mulf %67, %41 : vector<32x128xf32>
      %cst_35 = arith.constant 2.84571361E-5 : f32
      %69 = vector.broadcast %cst_35 : f32 to vector<32x128xf32>
      %70 = arith.mulf %69, %68 : vector<32x128xf32>
      %71 = arith.mulf %70, %65 : vector<32x128xf32>
      %cst_36 = arith.constant 1.000000e-10 : f32
      %72 = vector.broadcast %cst_36 : f32 to vector<32x128xf32>
      %73 = arith.addf %71, %72 : vector<32x128xf32>
      %c0_37 = arith.constant 0 : index
      %c0_38 = arith.constant 0 : index
      %74 = vector.load %arg3[%c0_37, %c0_38] : memref<32x128xf32, #tpu.memory_space<vmem>>, vector<32x128xf32>
      %75 = arith.mulf %73, %74 : vector<32x128xf32>
      %76 = vector.shape_cast %75 : vector<32x128xf32> to vector<1x32x128xf32>
      %cst_39 = arith.constant dense<0xFF800000> : vector<1xf32>
      %77 = vector.multi_reduction <maximumf>, %76, %cst_39 [1, 2] : vector<1x32x128xf32> to vector<1xf32>
      %78 = vector.shape_cast %77 : vector<1xf32> to vector<1x1x1xf32>
      %79 = vector.extract %78[0, 0, 0] : f32 from vector<1x1x1xf32>
      %cst_40 = arith.constant 3703.70361 : f32
      %80 = arith.divf %cst_40, %79 : f32
      %cst_41 = arith.constant 1.000000e+00 : f32
      %81 = arith.minimumf %80, %cst_41 : f32
      %82 = vector.extract_strided_slice %73 {offsets = [0, 1], sizes = [32, 127], strides = [1, 1]} : vector<32x128xf32> to vector<32x127xf32>
      %83 = vector.extract_strided_slice %73 {offsets = [0, 0], sizes = [32, 1], strides = [1, 1]} : vector<32x128xf32> to vector<32x1xf32>
      %84 = tpu.concatenate %82, %83 in 1 : vector<32x127xf32>, vector<32x1xf32> -> vector<32x128xf32>
      %85 = vector.extract_strided_slice %73 {offsets = [1, 0], sizes = [31, 128], strides = [1, 1]} : vector<32x128xf32> to vector<31x128xf32>
      %86 = vector.extract_strided_slice %73 {offsets = [0, 0], sizes = [1, 128], strides = [1, 1]} : vector<32x128xf32> to vector<1x128xf32>
      %87 = tpu.concatenate %85, %86 in 0 : vector<31x128xf32>, vector<1x128xf32> -> vector<32x128xf32>
      %88 = arith.addf %73, %87 : vector<32x128xf32>
      %cst_42 = arith.constant -5.000000e-03 : f32
      %89 = vector.broadcast %cst_42 : f32 to vector<32x128xf32>
      %90 = arith.mulf %89, %88 : vector<32x128xf32>
      %91 = arith.mulf %90, %53 : vector<32x128xf32>
      %92 = arith.addf %73, %84 : vector<32x128xf32>
      %cst_43 = arith.constant -5.000000e-03 : f32
      %93 = vector.broadcast %cst_43 : f32 to vector<32x128xf32>
      %94 = arith.mulf %93, %92 : vector<32x128xf32>
      %95 = arith.mulf %94, %54 : vector<32x128xf32>
      %96 = vector.extract_strided_slice %91 {offsets = [0, 127], sizes = [32, 1], strides = [1, 1]} : vector<32x128xf32> to vector<32x1xf32>
      %97 = vector.extract_strided_slice %91 {offsets = [0, 0], sizes = [32, 127], strides = [1, 1]} : vector<32x128xf32> to vector<32x127xf32>
      %98 = tpu.concatenate %96, %97 in 1 : vector<32x1xf32>, vector<32x127xf32> -> vector<32x128xf32>
      %99 = arith.subf %91, %98 : vector<32x128xf32>
      %100 = vector.extract_strided_slice %95 {offsets = [31, 0], sizes = [1, 128], strides = [1, 1]} : vector<32x128xf32> to vector<1x128xf32>
      %101 = vector.extract_strided_slice %95 {offsets = [0, 0], sizes = [31, 128], strides = [1, 1]} : vector<32x128xf32> to vector<31x128xf32>
      %102 = tpu.concatenate %100, %101 in 0 : vector<1x128xf32>, vector<31x128xf32> -> vector<32x128xf32>
      %103 = arith.subf %95, %102 : vector<32x128xf32>
      %104 = vector.extract_strided_slice %99 {offsets = [31, 0], sizes = [1, 128], strides = [1, 1]} : vector<32x128xf32> to vector<1x128xf32>
      %105 = vector.extract_strided_slice %99 {offsets = [0, 0], sizes = [31, 128], strides = [1, 1]} : vector<32x128xf32> to vector<31x128xf32>
      %106 = tpu.concatenate %104, %105 in 0 : vector<1x128xf32>, vector<31x128xf32> -> vector<32x128xf32>
      %cst_44 = arith.constant 0.00999999977 : f32
      %107 = vector.broadcast %cst_44 : f32 to vector<32x128xf32>
      %108 = arith.mulf %106, %107 : vector<32x128xf32>
      %109 = vector.extract_strided_slice %103 {offsets = [0, 127], sizes = [32, 1], strides = [1, 1]} : vector<32x128xf32> to vector<32x1xf32>
      %110 = vector.extract_strided_slice %103 {offsets = [0, 0], sizes = [32, 127], strides = [1, 1]} : vector<32x128xf32> to vector<32x127xf32>
      %111 = tpu.concatenate %109, %110 in 1 : vector<32x1xf32>, vector<32x127xf32> -> vector<32x128xf32>
      %cst_45 = arith.constant 0.00999999977 : f32
      %112 = vector.broadcast %cst_45 : f32 to vector<32x128xf32>
      %113 = arith.mulf %111, %112 : vector<32x128xf32>
      %114 = arith.addf %108, %113 : vector<32x128xf32>
      %cst_46 = arith.constant 0.000000e+00 : f32
      %115 = vector.broadcast %cst_46 : f32 to vector<32x128xf32>
      %116 = arith.subf %115, %114 : vector<32x128xf32>
      %c0_47 = arith.constant 0 : index
      %c0_48 = arith.constant 0 : index
      %117 = vector.load %arg4[%c0_47, %c0_48] : memref<32x128xf32, #tpu.memory_space<vmem>>, vector<32x128xf32>
      %118 = arith.addf %116, %31 : vector<32x128xf32>
      %119 = vector.broadcast %81 : f32 to vector<32x128xf32>
      %120 = arith.mulf %119, %118 : vector<32x128xf32>
      %121 = arith.mulf %117, %120 : vector<32x128xf32>
      %122 = arith.addf %29, %121 : vector<32x128xf32>
      %cst_49 = arith.constant 0.000000e+00 : f32
      %123 = vector.broadcast %cst_49 : f32 to vector<32x128xf32>
      %124 = arith.maximumf %122, %123 : vector<32x128xf32>
      %c0_50 = arith.constant 0 : index
      %c0_51 = arith.constant 0 : index
      %125 = vector.load %arg0[%c0_50, %c0_51] : memref<32x128xf32, #tpu.memory_space<vmem>>, vector<32x128xf32>
      %126 = arith.addf %125, %124 : vector<32x128xf32>
      %c0_52 = arith.constant 0 : index
      %c0_53 = arith.constant 0 : index
      %127 = vector.load %arg7[%c0_52, %c0_53] : memref<32x128xf32, #tpu.memory_space<vmem>>, vector<32x128xf32>
      tpu.vector_store %arg7[%c0_52, %c0_53], %124 {strides = array<i32>} : memref<32x128xf32, #tpu.memory_space<vmem>>, vector<32x128xf32>,
      %c0_54 = arith.constant 0 : index
      %c0_55 = arith.constant 0 : index
      %128 = vector.load %arg8[%c0_54, %c0_55] : memref<32x128xf32, #tpu.memory_space<vmem>>, vector<32x128xf32>
      tpu.vector_store %arg8[%c0_54, %c0_55], %126 {strides = array<i32>} : memref<32x128xf32, #tpu.memory_space<vmem>>, vector<32x128xf32>,
      %129 = arith.addf %arg11, %81 : f32
      %130 = arith.subf %129, %arg12 : f32
      %cst_56 = arith.constant 5.000000e+00 : f32
      %131 = arith.cmpf oge, %130, %cst_56 : f32
      %132 = arith.extui %131 : i1 to i32
      %c0_i32 = arith.constant 0 : i32
      %133 = arith.cmpi ne, %132, %c0_i32 : i32
      scf.if %133 {
        %c0_62 = arith.constant 0 : index
        %c0_63 = arith.constant 0 : index
        %142 = memref.load %arg5[%c0_62, %c0_63] : memref<1x1xf32, #tpu.memory_space<smem>>
        %cst_64 = arith.constant 6.500000e-03 : f32
        %143 = vector.broadcast %cst_64 : f32 to vector<32x128xf32>
        %144 = arith.mulf %143, %126 : vector<32x128xf32>
        %145 = vector.broadcast %142 : f32 to vector<32x128xf32>
        %146 = arith.subf %145, %144 : vector<32x128xf32>
        %c0_65 = arith.constant 0 : index
        %c0_66 = arith.constant 0 : index
        %147 = memref.load %arg6[%c0_65, %c0_66] : memref<1x1xf32, #tpu.memory_space<smem>>
        %cst_67 = arith.constant 6.500000e-03 : f32
        %148 = vector.broadcast %cst_67 : f32 to vector<32x128xf32>
        %149 = arith.mulf %148, %126 : vector<32x128xf32>
        %150 = vector.broadcast %147 : f32 to vector<32x128xf32>
        %151 = arith.subf %150, %149 : vector<32x128xf32>
        %cst_68 = arith.constant 0.000000e+00 : f32
        %152 = vector.broadcast %cst_68 : f32 to vector<32x128xf32>
        %153 = arith.cmpf ole, %146, %152 : vector<32x128xf32>
        %c0_69 = arith.constant 0 : index
        %c0_70 = arith.constant 0 : index
        %154 = vector.load %arg1[%c0_69, %c0_70] : memref<32x128xf32, #tpu.memory_space<vmem>>, vector<32x128xf32>
        %cst_71 = arith.constant 0.000000e+00 : f32
        %155 = vector.broadcast %cst_71 : f32 to vector<32x128xf32>
        %156 = arith.select %153, %154, %155 : vector<32x128xi1>, vector<32x128xf32>
        %cst_72 = arith.constant 0.000000e+00 : f32
        %157 = vector.broadcast %cst_72 : f32 to vector<32x128xf32>
        %158 = arith.maximumf %151, %157 : vector<32x128xf32>
        %cst_73 = arith.constant 5.000000e-01 : f32
        %159 = vector.broadcast %cst_73 : f32 to vector<32x128xf32>
        %160 = arith.mulf %159, %158 : vector<32x128xf32>
        %161 = arith.subf %156, %160 : vector<32x128xf32>
        %c0_74 = arith.constant 0 : index
        %c0_75 = arith.constant 0 : index
        %162 = vector.load %arg2[%c0_74, %c0_75] : memref<32x128xf32, #tpu.memory_space<vmem>>, vector<32x128xf32>
        %163 = arith.mulf %161, %162 : vector<32x128xf32>
        %c0_76 = arith.constant 0 : index
        %c0_77 = arith.constant 0 : index
        %164 = vector.load %arg9[%c0_76, %c0_77] : memref<32x128xf32, #tpu.memory_space<vmem>>, vector<32x128xf32>
        tpu.vector_store %arg9[%c0_76, %c0_77], %163 {strides = array<i32>} : memref<32x128xf32, #tpu.memory_space<vmem>>, vector<32x128xf32>,
      } else {
      }
      %134 = arith.select %131, %129, %arg12 : f32
      %c0_57 = arith.constant 0 : index
      %135 = memref.load %arg10[%c0_57] : memref<2xf32, #tpu.memory_space<smem>>
      memref.store %129, %arg10[%c0_57] : memref<2xf32, #tpu.memory_space<smem>>
      %c1 = arith.constant 1 : index
      %136 = memref.load %arg10[%c1] : memref<2xf32, #tpu.memory_space<smem>>
      memref.store %134, %arg10[%c1] : memref<2xf32, #tpu.memory_space<smem>>
      %cst_58 = arith.constant 2.000000e+01 : f32
      %137 = arith.cmpf olt, %129, %cst_58 : f32
      %138 = arith.extui %137 : i1 to i32
      %c0_i32_59 = arith.constant 0 : i32
      %139 = arith.cmpi ne, %138, %c0_i32_59 : i32
      scf.if %139 {
        %c0_62 = arith.constant 0 : index
        %c0_63 = arith.constant 0 : index
        %142 = vector.load %arg7[%c0_62, %c0_63] : memref<32x128xf32, #tpu.memory_space<vmem>>, vector<32x128xf32>
        %c0_64 = arith.constant 0 : index
        %c0_65 = arith.constant 0 : index
        %143 = vector.load %arg8[%c0_64, %c0_65] : memref<32x128xf32, #tpu.memory_space<vmem>>, vector<32x128xf32>
        %c0_66 = arith.constant 0 : index
        %c0_67 = arith.constant 0 : index
        %144 = vector.load %arg9[%c0_66, %c0_67] : memref<32x128xf32, #tpu.memory_space<vmem>>, vector<32x128xf32>
        %145 = vector.extract_strided_slice %142 {offsets = [0, 1], sizes = [32, 127], strides = [1, 1]} : vector<32x128xf32> to vector<32x127xf32>
        %146 = vector.extract_strided_slice %142 {offsets = [0, 0], sizes = [32, 1], strides = [1, 1]} : vector<32x128xf32> to vector<32x1xf32>
        %147 = tpu.concatenate %145, %146 in 1 : vector<32x127xf32>, vector<32x1xf32> -> vector<32x128xf32>
        %148 = arith.addf %142, %147 : vector<32x128xf32>
        %149 = vector.extract_strided_slice %148 {offsets = [1, 0], sizes = [31, 128], strides = [1, 1]} : vector<32x128xf32> to vector<31x128xf32>
        %150 = vector.extract_strided_slice %148 {offsets = [0, 0], sizes = [1, 128], strides = [1, 1]} : vector<32x128xf32> to vector<1x128xf32>
        %151 = tpu.concatenate %149, %150 in 0 : vector<31x128xf32>, vector<1x128xf32> -> vector<32x128xf32>
        %152 = arith.addf %148, %151 : vector<32x128xf32>
        %cst_68 = arith.constant 2.500000e-01 : f32
        %153 = vector.broadcast %cst_68 : f32 to vector<32x128xf32>
        %154 = arith.mulf %153, %152 : vector<32x128xf32>
        %155 = vector.extract_strided_slice %143 {offsets = [0, 1], sizes = [32, 127], strides = [1, 1]} : vector<32x128xf32> to vector<32x127xf32>
        %156 = vector.extract_strided_slice %143 {offsets = [0, 0], sizes = [32, 1], strides = [1, 1]} : vector<32x128xf32> to vector<32x1xf32>
        %157 = tpu.concatenate %155, %156 in 1 : vector<32x127xf32>, vector<32x1xf32> -> vector<32x128xf32>
        %158 = vector.extract_strided_slice %143 {offsets = [1, 0], sizes = [31, 128], strides = [1, 1]} : vector<32x128xf32> to vector<31x128xf32>
        %159 = vector.extract_strided_slice %143 {offsets = [0, 0], sizes = [1, 128], strides = [1, 1]} : vector<32x128xf32> to vector<1x128xf32>
        %160 = tpu.concatenate %158, %159 in 0 : vector<31x128xf32>, vector<1x128xf32> -> vector<32x128xf32>
        %161 = vector.extract_strided_slice %160 {offsets = [0, 1], sizes = [32, 127], strides = [1, 1]} : vector<32x128xf32> to vector<32x127xf32>
        %162 = vector.extract_strided_slice %160 {offsets = [0, 0], sizes = [32, 1], strides = [1, 1]} : vector<32x128xf32> to vector<32x1xf32>
        %163 = tpu.concatenate %161, %162 in 1 : vector<32x127xf32>, vector<32x1xf32> -> vector<32x128xf32>
        %164 = arith.subf %157, %143 : vector<32x128xf32>
        %165 = arith.subf %160, %143 : vector<32x128xf32>
        %166 = arith.subf %163, %160 : vector<32x128xf32>
        %167 = arith.subf %163, %157 : vector<32x128xf32>
        %168 = arith.addf %164, %166 : vector<32x128xf32>
        %cst_69 = arith.constant 5.000000e-03 : f32
        %169 = vector.broadcast %cst_69 : f32 to vector<32x128xf32>
        %170 = arith.mulf %169, %168 : vector<32x128xf32>
        %171 = arith.addf %165, %167 : vector<32x128xf32>
        %cst_70 = arith.constant 5.000000e-03 : f32
        %172 = vector.broadcast %cst_70 : f32 to vector<32x128xf32>
        %173 = arith.mulf %172, %171 : vector<32x128xf32>
        %174 = arith.mulf %170, %170 : vector<32x128xf32>
        %175 = arith.mulf %173, %173 : vector<32x128xf32>
        %176 = arith.addf %174, %175 : vector<32x128xf32>
        %cst_71 = arith.constant 1.000000e-10 : f32
        %177 = vector.broadcast %cst_71 : f32 to vector<32x128xf32>
        %178 = arith.addf %176, %177 : vector<32x128xf32>
        %179 = arith.mulf %154, %154 : vector<32x128xf32>
        %180 = arith.mulf %179, %179 : vector<32x128xf32>
        %181 = arith.mulf %180, %154 : vector<32x128xf32>
        %cst_72 = arith.constant 2.84571361E-5 : f32
        %182 = vector.broadcast %cst_72 : f32 to vector<32x128xf32>
        %183 = arith.mulf %182, %181 : vector<32x128xf32>
        %184 = arith.mulf %183, %178 : vector<32x128xf32>
        %cst_73 = arith.constant 1.000000e-10 : f32
        %185 = vector.broadcast %cst_73 : f32 to vector<32x128xf32>
        %186 = arith.addf %184, %185 : vector<32x128xf32>
        %c0_74 = arith.constant 0 : index
        %c0_75 = arith.constant 0 : index
        %187 = vector.load %arg3[%c0_74, %c0_75] : memref<32x128xf32, #tpu.memory_space<vmem>>, vector<32x128xf32>
        %188 = arith.mulf %186, %187 : vector<32x128xf32>
        %189 = vector.shape_cast %188 : vector<32x128xf32> to vector<1x32x128xf32>
        %cst_76 = arith.constant dense<0xFF800000> : vector<1xf32>
        %190 = vector.multi_reduction <maximumf>, %189, %cst_76 [1, 2] : vector<1x32x128xf32> to vector<1xf32>
        %191 = vector.shape_cast %190 : vector<1xf32> to vector<1x1x1xf32>
        %192 = vector.extract %191[0, 0, 0] : f32 from vector<1x1x1xf32>
        %cst_77 = arith.constant 3703.70361 : f32
        %193 = arith.divf %cst_77, %192 : f32
        %cst_78 = arith.constant 1.000000e+00 : f32
        %194 = arith.minimumf %193, %cst_78 : f32
        %195 = vector.extract_strided_slice %186 {offsets = [0, 1], sizes = [32, 127], strides = [1, 1]} : vector<32x128xf32> to vector<32x127xf32>
        %196 = vector.extract_strided_slice %186 {offsets = [0, 0], sizes = [32, 1], strides = [1, 1]} : vector<32x128xf32> to vector<32x1xf32>
        %197 = tpu.concatenate %195, %196 in 1 : vector<32x127xf32>, vector<32x1xf32> -> vector<32x128xf32>
        %198 = vector.extract_strided_slice %186 {offsets = [1, 0], sizes = [31, 128], strides = [1, 1]} : vector<32x128xf32> to vector<31x128xf32>
        %199 = vector.extract_strided_slice %186 {offsets = [0, 0], sizes = [1, 128], strides = [1, 1]} : vector<32x128xf32> to vector<1x128xf32>
        %200 = tpu.concatenate %198, %199 in 0 : vector<31x128xf32>, vector<1x128xf32> -> vector<32x128xf32>
        %201 = arith.addf %186, %200 : vector<32x128xf32>
        %cst_79 = arith.constant -5.000000e-03 : f32
        %202 = vector.broadcast %cst_79 : f32 to vector<32x128xf32>
        %203 = arith.mulf %202, %201 : vector<32x128xf32>
        %204 = arith.mulf %203, %166 : vector<32x128xf32>
        %205 = arith.addf %186, %197 : vector<32x128xf32>
        %cst_80 = arith.constant -5.000000e-03 : f32
        %206 = vector.broadcast %cst_80 : f32 to vector<32x128xf32>
        %207 = arith.mulf %206, %205 : vector<32x128xf32>
        %208 = arith.mulf %207, %167 : vector<32x128xf32>
        %209 = vector.extract_strided_slice %204 {offsets = [0, 127], sizes = [32, 1], strides = [1, 1]} : vector<32x128xf32> to vector<32x1xf32>
        %210 = vector.extract_strided_slice %204 {offsets = [0, 0], sizes = [32, 127], strides = [1, 1]} : vector<32x128xf32> to vector<32x127xf32>
        %211 = tpu.concatenate %209, %210 in 1 : vector<32x1xf32>, vector<32x127xf32> -> vector<32x128xf32>
        %212 = arith.subf %204, %211 : vector<32x128xf32>
        %213 = vector.extract_strided_slice %208 {offsets = [31, 0], sizes = [1, 128], strides = [1, 1]} : vector<32x128xf32> to vector<1x128xf32>
        %214 = vector.extract_strided_slice %208 {offsets = [0, 0], sizes = [31, 128], strides = [1, 1]} : vector<32x128xf32> to vector<31x128xf32>
        %215 = tpu.concatenate %213, %214 in 0 : vector<1x128xf32>, vector<31x128xf32> -> vector<32x128xf32>
        %216 = arith.subf %208, %215 : vector<32x128xf32>
        %217 = vector.extract_strided_slice %212 {offsets = [31, 0], sizes = [1, 128], strides = [1, 1]} : vector<32x128xf32> to vector<1x128xf32>
        %218 = vector.extract_strided_slice %212 {offsets = [0, 0], sizes = [31, 128], strides = [1, 1]} : vector<32x128xf32> to vector<31x128xf32>
        %219 = tpu.concatenate %217, %218 in 0 : vector<1x128xf32>, vector<31x128xf32> -> vector<32x128xf32>
        %cst_81 = arith.constant 0.00999999977 : f32
        %220 = vector.broadcast %cst_81 : f32 to vector<32x128xf32>
        %221 = arith.mulf %219, %220 : vector<32x128xf32>
        %222 = vector.extract_strided_slice %216 {offsets = [0, 127], sizes = [32, 1], strides = [1, 1]} : vector<32x128xf32> to vector<32x1xf32>
        %223 = vector.extract_strided_slice %216 {offsets = [0, 0], sizes = [32, 127], strides = [1, 1]} : vector<32x128xf32> to vector<32x127xf32>
        %224 = tpu.concatenate %222, %223 in 1 : vector<32x1xf32>, vector<32x127xf32> -> vector<32x128xf32>
        %cst_82 = arith.constant 0.00999999977 : f32
        %225 = vector.broadcast %cst_82 : f32 to vector<32x128xf32>
        %226 = arith.mulf %224, %225 : vector<32x128xf32>
        %227 = arith.addf %221, %226 : vector<32x128xf32>
        %cst_83 = arith.constant 0.000000e+00 : f32
        %228 = vector.broadcast %cst_83 : f32 to vector<32x128xf32>
        %229 = arith.subf %228, %227 : vector<32x128xf32>
        %c0_84 = arith.constant 0 : index
        %c0_85 = arith.constant 0 : index
        %230 = vector.load %arg4[%c0_84, %c0_85] : memref<32x128xf32, #tpu.memory_space<vmem>>, vector<32x128xf32>
        %231 = arith.addf %229, %144 : vector<32x128xf32>
        %232 = vector.broadcast %194 : f32 to vector<32x128xf32>
        %233 = arith.mulf %232, %231 : vector<32x128xf32>
        %234 = arith.mulf %230, %233 : vector<32x128xf32>
        %235 = arith.addf %142, %234 : vector<32x128xf32>
        %cst_86 = arith.constant 0.000000e+00 : f32
        %236 = vector.broadcast %cst_86 : f32 to vector<32x128xf32>
        %237 = arith.maximumf %235, %236 : vector<32x128xf32>
        %c0_87 = arith.constant 0 : index
        %c0_88 = arith.constant 0 : index
        %238 = vector.load %arg0[%c0_87, %c0_88] : memref<32x128xf32, #tpu.memory_space<vmem>>, vector<32x128xf32>
        %239 = arith.addf %238, %237 : vector<32x128xf32>
        %c0_89 = arith.constant 0 : index
        %c0_90 = arith.constant 0 : index
        %240 = vector.load %arg7[%c0_89, %c0_90] : memref<32x128xf32, #tpu.memory_space<vmem>>, vector<32x128xf32>
        tpu.vector_store %arg7[%c0_89, %c0_90], %237 {strides = array<i32>} : memref<32x128xf32, #tpu.memory_space<vmem>>, vector<32x128xf32>,
        %c0_91 = arith.constant 0 : index
        %c0_92 = arith.constant 0 : index
        %241 = vector.load %arg8[%c0_91, %c0_92] : memref<32x128xf32, #tpu.memory_space<vmem>>, vector<32x128xf32>
        tpu.vector_store %arg8[%c0_91, %c0_92], %239 {strides = array<i32>} : memref<32x128xf32, #tpu.memory_space<vmem>>, vector<32x128xf32>,
        %242 = arith.addf %129, %194 : f32
        %243 = arith.subf %242, %134 : f32
        %cst_93 = arith.constant 5.000000e+00 : f32
        %244 = arith.cmpf oge, %243, %cst_93 : f32
        %245 = arith.extui %244 : i1 to i32
        %c0_i32_94 = arith.constant 0 : i32
        %246 = arith.cmpi ne, %245, %c0_i32_94 : i32
        scf.if %246 {
          %c0_97 = arith.constant 0 : index
          %c0_98 = arith.constant 0 : index
          %250 = memref.load %arg5[%c0_97, %c0_98] : memref<1x1xf32, #tpu.memory_space<smem>>
          %cst_99 = arith.constant 6.500000e-03 : f32
          %251 = vector.broadcast %cst_99 : f32 to vector<32x128xf32>
          %252 = arith.mulf %251, %239 : vector<32x128xf32>
          %253 = vector.broadcast %250 : f32 to vector<32x128xf32>
          %254 = arith.subf %253, %252 : vector<32x128xf32>
          %c0_100 = arith.constant 0 : index
          %c0_101 = arith.constant 0 : index
          %255 = memref.load %arg6[%c0_100, %c0_101] : memref<1x1xf32, #tpu.memory_space<smem>>
          %cst_102 = arith.constant 6.500000e-03 : f32
          %256 = vector.broadcast %cst_102 : f32 to vector<32x128xf32>
          %257 = arith.mulf %256, %239 : vector<32x128xf32>
          %258 = vector.broadcast %255 : f32 to vector<32x128xf32>
          %259 = arith.subf %258, %257 : vector<32x128xf32>
          %cst_103 = arith.constant 0.000000e+00 : f32
          %260 = vector.broadcast %cst_103 : f32 to vector<32x128xf32>
          %261 = arith.cmpf ole, %254, %260 : vector<32x128xf32>
          %c0_104 = arith.constant 0 : index
          %c0_105 = arith.constant 0 : index
          %262 = vector.load %arg1[%c0_104, %c0_105] : memref<32x128xf32, #tpu.memory_space<vmem>>, vector<32x128xf32>
          %cst_106 = arith.constant 0.000000e+00 : f32
          %263 = vector.broadcast %cst_106 : f32 to vector<32x128xf32>
          %264 = arith.select %261, %262, %263 : vector<32x128xi1>, vector<32x128xf32>
          %cst_107 = arith.constant 0.000000e+00 : f32
          %265 = vector.broadcast %cst_107 : f32 to vector<32x128xf32>
          %266 = arith.maximumf %259, %265 : vector<32x128xf32>
          %cst_108 = arith.constant 5.000000e-01 : f32
          %267 = vector.broadcast %cst_108 : f32 to vector<32x128xf32>
          %268 = arith.mulf %267, %266 : vector<32x128xf32>
          %269 = arith.subf %264, %268 : vector<32x128xf32>
          %c0_109 = arith.constant 0 : index
          %c0_110 = arith.constant 0 : index
          %270 = vector.load %arg2[%c0_109, %c0_110] : memref<32x128xf32, #tpu.memory_space<vmem>>, vector<32x128xf32>
          %271 = arith.mulf %269, %270 : vector<32x128xf32>
          %c0_111 = arith.constant 0 : index
          %c0_112 = arith.constant 0 : index
          %272 = vector.load %arg9[%c0_111, %c0_112] : memref<32x128xf32, #tpu.memory_space<vmem>>, vector<32x128xf32>
          tpu.vector_store %arg9[%c0_111, %c0_112], %271 {strides = array<i32>} : memref<32x128xf32, #tpu.memory_space<vmem>>, vector<32x128xf32>,
        } else {
        }
        %247 = arith.select %244, %242, %134 : f32
        %c0_95 = arith.constant 0 : index
        %248 = memref.load %arg10[%c0_95] : memref<2xf32, #tpu.memory_space<smem>>
        memref.store %242, %arg10[%c0_95] : memref<2xf32, #tpu.memory_space<smem>>
        %c1_96 = arith.constant 1 : index
        %249 = memref.load %arg10[%c1_96] : memref<2xf32, #tpu.memory_space<smem>>
        memref.store %247, %arg10[%c1_96] : memref<2xf32, #tpu.memory_space<smem>>
      } else {
      }
      %c0_60 = arith.constant 0 : index
      %140 = memref.load %arg10[%c0_60] : memref<2xf32, #tpu.memory_space<smem>>
      %c1_61 = arith.constant 1 : index
      %141 = memref.load %arg10[%c1_61] : memref<2xf32, #tpu.memory_space<smem>>
      scf.yield %140, %141 : f32, f32
    }
    return
  }
}

</mosaic_0001>

<bundles_post_ra>
// kernel: forward.1
= control target key start
LH: loop header
LB: loop body
LE: loop exit
PB: predicated region body
PF: predicated region fallthrough
CT: control target
= control target key end

     0   :  { %s1688_s0 = inlined_call_operand.vmem [shape: f32[32,128], index: 0, kind: input, shape index: {}]   ;;  %s1689_s1 = inlined_call_operand.vmem [shape: f32[32,128], index: 1, kind: input, shape index: {}]   ;;  %s1690_s2 = inlined_call_operand.vmem [shape: f32[32,128], index: 2, kind: input, shape index: {}]   ;;  %s1691_s3 = inlined_call_operand.vmem [shape: f32[32,128], index: 3, kind: input, shape index: {}]   ;;  %s1692_s4 = inlined_call_operand.vmem [shape: f32[32,128], index: 4, kind: input, shape index: {}]   ;;  %s1693_s5 = inlined_call_operand.<no memory space> [shape: f32[1,1], index: 5, kind: input, shape index: {}]   ;;  %s1694_s6 = inlined_call_operand.<no memory space> [shape: f32[1,1], index: 6, kind: input, shape index: {}]   ;;  %s1695_s7 = inlined_call_operand.hbm [shape: f32[32,128], index: 7, kind: output, shape index: {}]  }
   0x1   :  { %12 = sst [smem:[#allocation5]] %s1693_s5 }
   0x2   :  { %13 = sst [smem:[#allocation6]] %s1694_s6 }
   0x3   :  { %14 = vsyncpa [#allocation8], 0  ;;  %v33_v0 = vld [vmem:[%s1688_s0] sm:$0xff]  ;;  %v34_v1 = vld [vmem:[%s1688_s0 + $0x8] sm:$0xff]  ;;  %v1100_v2 = vmov 0.0   ;;  %s45_s11 = sld [smem:[#allocation5]] }
   0x4   :  { %29 = vst [vmem:[#allocation7] sm:$0xff] %v1100_v2  ;;  %30 = vst [vmem:[#allocation7 + $0x8] sm:$0xff] %v1100_v2  ;;  %v35_v3 = vld [vmem:[%s1688_s0 + $0x10] sm:$0xff]  ;;  %v36_v4 = vld [vmem:[%s1688_s0 + $0x18] sm:$0xff]  ;;  %s55_s12 = sld [smem:[#allocation6]]  ;;  %s1210_s29 = smov 0.0  }
   0x5   :  { %31 = vst [vmem:[#allocation7 + $0x10] sm:$0xff] %v1100_v2  ;;  %32 = vst [vmem:[#allocation7 + $0x18] sm:$0xff] %v1100_v2  ;;  %v46_v5 = vmul.f32 0.0065, %v33_v0  ;;  %v47_v6 = vmul.f32 0.0065, %v34_v1 }
   0x6   :  { %37 = vst [vmem:[#allocation2] sm:$0xff] %v33_v0  ;;  %38 = vst [vmem:[#allocation2 + $0x8] sm:$0xff] %v34_v1  ;;  %v48_v7 = vmul.f32 0.0065, %v35_v3  ;;  %v49_v8 = vmul.f32 0.0065, %v36_v4 }
   0x7   :  { %39 = vst [vmem:[#allocation2 + $0x10] sm:$0xff] %v35_v3  ;;  %40 = vst [vmem:[#allocation2 + $0x18] sm:$0xff] %v36_v4  ;;  %v65_v12 = vld [vmem:[%s1689_s1] sm:$0xff]  ;;  %v66_v17 = vld [vmem:[%s1689_s1 + $0x8] sm:$0xff]  ;;  %s1212_s30 = smov 0.0  }
   0x8   :  { %v67_v23 = vld [vmem:[%s1689_s1 + $0x10] sm:$0xff]  ;;  %v68_v25 = vld [vmem:[%s1689_s1 + $0x18] sm:$0xff]  ;;  %v85_v36 = vld [vmem:[%s1690_s2] sm:$0xff] }
   0x9   :  { %v50_v9 = vstv %s45_s11  ;;  %v86_v37 = vld [vmem:[%s1690_s2 + $0x8] sm:$0xff]  ;;  %v87_v42 = vld [vmem:[%s1690_s2 + $0x10] sm:$0xff]  ;;  %v88_v43 = vld [vmem:[%s1690_s2 + $0x18] sm:$0xff] }
   0xa   :  { %v51_v10 = vsub.f32 %v50_v9, %v46_v5  ;;  %v56_v11 = vstv %s55_s12  ;;  %v52_v13 = vsub.f32 %v50_v9, %v47_v6  ;;  %v53_v14 = vsub.f32 %v50_v9, %v48_v7 }
   0xb   :  { %v57_v15 = vsub.f32 %v56_v11, %v46_v5  ;;  %v58_v16 = vsub.f32 %v56_v11, %v47_v6  ;;  %v59_v18 = vsub.f32 %v56_v11, %v48_v7  ;;  %v54_v19 = vsub.f32 %v50_v9, %v49_v8 }
   0xc   :  { %vm1174_vm0 = vcmp.le.f32.partialorder %v51_v10, 0.0  ;;  %vm1178_vm1 = vcmp.le.f32.partialorder %v52_v13, 0.0  ;;  %vm1182_vm2 = vcmp.le.f32.partialorder %v53_v14, 0.0  ;;  %v60_v24 = vsub.f32 %v56_v11, %v49_v8 }
   0xd   :  { %v69_v26 = vsel %vm1174_vm0, %v65_v12, 0.0  ;;  %v73_v27 = vmax.f32 %v57_v15, 0.0  ;;  %v74_v28 = vmax.f32 %v58_v16, 0.0  ;;  %v70_v29 = vsel %vm1178_vm1, %v66_v17, 0.0 }
   0xe   :  { %v75_v30 = vmax.f32 %v59_v18, 0.0  ;;  %vm64_vm3 = vcmp.le.f32.partialorder %v54_v19, 0.0  ;;  %v76_v31 = vmax.f32 %v60_v24, 0.0  ;;  %v71_v34 = vsel %vm1182_vm2, %v67_v23, 0.0 }
   0xf   :  { %v77_v32 = vmul.f32 0.5, %v73_v27  ;;  %v78_v33 = vmul.f32 0.5, %v74_v28  ;;  %v72_v35 = vsel %vm64_vm3, %v68_v25, 0.0 }
  0x10   :  { %v79_v38 = vmul.f32 0.5, %v75_v30  ;;  %v80_v39 = vmul.f32 0.5, %v76_v31 }
  0x11   :  { %v81_v40 = vsub.f32 %v69_v26, %v77_v32  ;;  %v82_v41 = vsub.f32 %v70_v29, %v78_v33 }
  0x12   :  { %v83_v44 = vsub.f32 %v71_v34, %v79_v38  ;;  %v84_v45 = vsub.f32 %v72_v35, %v80_v39 }
  0x13   :  { %v89_v46 = vmul.f32 %v85_v36, %v81_v40  ;;  %v90_v47 = vmul.f32 %v86_v37, %v82_v41 }
  0x14   :  { %v91_v48 = vmul.f32 %v87_v42, %v83_v44  ;;  %v92_v49 = vmul.f32 %v88_v43, %v84_v45 }
  0x15   :  { %93 = vst [vmem:[#allocation3] sm:$0xff] %v89_v46  ;;  %94 = vst [vmem:[#allocation3 + $0x8] sm:$0xff] %v90_v47 }
  0x16   :  { %95 = vst [vmem:[#allocation3 + $0x10] sm:$0xff] %v91_v48  ;;  %96 = vst [vmem:[#allocation3 + $0x18] sm:$0xff] %v92_v49 }
  0x17 LB: > { %v1220_v50 = vld [vmem:[#allocation7 + $0x10] sm:$0xff]  ;;  %v1222_v51 = vld [vmem:[#allocation7] sm:$0xff]  ;;  %s1101_s8 = smov 127   ;;  %v1228_v52 = vld [vmem:[#allocation7 + $0x18] sm:$0xff]  ;;  %vm140_vm4 = vcmask 1046528   ;;  %s1102_s15 = smov 1   ;;  %s1098_s30 = sphi %s1212_s30, %s994_s30   ;;  %s1094_s29 = sphi %s1210_s29, %s1021_s29  }
  0x18   : > { %124 = vrot.lane.b32.xlu1 %v1220_v50, %s1101_s8  ;;  %120 = vrot.lane.b32.xlu0 %v1222_v51, %s1101_s8  ;;  %v1230_v53 = vld [vmem:[#allocation7 + $0x8] sm:$0xff]  ;;  %v1238_v55 = vld [vmem:[#allocation2] sm:$0xff]  ;;  %v1240_v56 = vld [vmem:[#allocation2 + $0x10] sm:$0xff]  ;;  %vm380_vm5 = vcmask 1040384   ;;  %s1103_s19 = smov 1.0  }
  0x19   : > { %v1236_v54 = vld [vmem:[#allocation2 + $0x8] sm:$0xff]  ;;  %v1246_v57 = vld [vmem:[#allocation2 + $0x18] sm:$0xff]  ;;  %v181_v59 = vrot.slane %v1240_v56, 1  ;;  %v178_v60 = vrot.slane %v1238_v55, 1 }
  0x1a   : > { %v179_v58 = vrot.slane %v1236_v54, 1  ;;  %v183_v63 = vrot.slane %v1246_v57, 1 }
  0x1c   : > { %126 = vrot.lane.b32.xlu1 %v1228_v52, %s1101_s8  ;;  %122 = vrot.lane.b32.xlu0 %v1230_v53, %s1101_s8  ;;  %v182_v61 = vsel %vm140_vm4, %v179_v58, %v181_v59  ;;  %v180_v62 = vsel %vm140_vm4, %v178_v60, %v179_v58  ;;  %v1261_v0 = vsel %vm140_vm4, %v183_v63, %v178_v60 }
  0x1d   : > { %v1264_v1 = vsel %vm140_vm4, %v181_v59, %v183_v63  ;;  %v209_v31 = vsub.f32 %v182_v61, %v1236_v54  ;;  %v208_v32 = vsub.f32 %v180_v62, %v1238_v55  ;;  %v211_v45 = vsub.f32 %v1261_v0, %v1246_v57 }
  0x1e   : > { %v210_v46 = vsub.f32 %v1264_v1, %v1240_v56 }
  0x20   : > { %168 = vrot.lane.b32.xlu1 %v1236_v54, %s1101_s8  ;;  %166 = vrot.lane.b32.xlu0 %v1238_v55, %s1101_s8 }
  0x24   : > { %172 = vrot.lane.b32.xlu1 %v1246_v57, %s1101_s8  ;;  %170 = vrot.lane.b32.xlu0 %v1240_v56, %s1101_s8 }
  0x28   : > { %194 = vrot.lane.b32.xlu1 %v182_v61, %s1101_s8  ;;  %192 = vrot.lane.b32.xlu0 %v180_v62, %s1101_s8 }
  0x2c   : > { %198 = vrot.lane.b32.xlu1 %v1261_v0, %s1101_s8  ;;  %196 = vrot.lane.b32.xlu0 %v1264_v1, %s1101_s8 }
  0x8a   : > { %v125_v2 = vpop.permute.xlu1 %124  ;;  %v121_v3 = vpop.permute.xlu0 %120 }
  0x8b   : > { %v134_v4 = vadd.f32 %v125_v2, %v1220_v50  ;;  %v132_v5 = vadd.f32 %v121_v3, %v1222_v51 }
  0x8d   : > { %v144_v10 = vrot.slane %v134_v4, 1  ;;  %v141_v11 = vrot.slane %v132_v5, 1 }
  0x8e   : > { %v127_v6 = vpop.permute.xlu1 %126  ;;  %v123_v7 = vpop.permute.xlu0 %122 }
  0x8f   : > { %v135_v8 = vadd.f32 %v127_v6, %v1228_v52  ;;  %v133_v9 = vadd.f32 %v123_v7, %v1230_v53 }
  0x91   : > { %v146_v12 = vrot.slane %v135_v8, 1  ;;  %v142_v13 = vrot.slane %v133_v9, 1 }
  0x92   : > { %v169_v14 = vpop.permute.xlu1 %168  ;;  %v167_v15 = vpop.permute.xlu0 %166 }
  0x93   : > { %v147_v16 = vsel %vm140_vm4, %v144_v10, %v146_v12  ;;  %v153_v17 = vsel %vm140_vm4, %v146_v12, %v141_v11  ;;  %v143_v18 = vsel %vm140_vm4, %v141_v11, %v142_v13  ;;  %v145_v19 = vsel %vm140_vm4, %v142_v13, %v144_v10 }
  0x94   : > { %v157_v20 = vadd.f32 %v153_v17, %v135_v8  ;;  %v154_v21 = vadd.f32 %v143_v18, %v132_v5  ;;  %v155_v22 = vadd.f32 %v145_v19, %v133_v9  ;;  %v156_v23 = vadd.f32 %v147_v16, %v134_v4 }
  0x95   : > { %v205_v33 = vsub.f32 %v169_v14, %v1236_v54  ;;  %v204_v34 = vsub.f32 %v167_v15, %v1238_v55 }
  0x96   : > { %v161_v24 = vmul.f32 0.25, %v157_v20  ;;  %v158_v25 = vmul.f32 0.25, %v154_v21  ;;  %v159_v26 = vmul.f32 0.25, %v155_v22  ;;  %v173_v27 = vpop.permute.xlu1 %172  ;;  %v171_v28 = vpop.permute.xlu0 %170  ;;  %v160_v35 = vmul.f32 0.25, %v156_v23 }
  0x97   : > { %v207_v47 = vsub.f32 %v173_v27, %v1246_v57 }
  0x98   : > { %v252_v29 = vmul.f32 %v158_v25, %v158_v25  ;;  %v253_v30 = vmul.f32 %v159_v26, %v159_v26  ;;  %v255_v36 = vmul.f32 %v161_v24, %v161_v24  ;;  %v254_v58 = vmul.f32 %v160_v35, %v160_v35 }
  0x9a   : > { %v256_v37 = vmul.f32 %v252_v29, %v252_v29  ;;  %v257_v38 = vmul.f32 %v253_v30, %v253_v30  ;;  %v195_v39 = vpop.permute.xlu1 %194  ;;  %v193_v40 = vpop.permute.xlu0 %192  ;;  %v259_v59 = vmul.f32 %v255_v36, %v255_v36 }
  0x9b   : > { %v1282_v41 = vsub.f32 %v195_v39, %v182_v61  ;;  %v1284_v42 = vsub.f32 %v195_v39, %v169_v14  ;;  %v1286_v43 = vsub.f32 %v193_v40, %v180_v62  ;;  %v1288_v44 = vsub.f32 %v193_v40, %v167_v15 }
  0x9c   : > { %v260_v60 = vmul.f32 %v256_v37, %v158_v25  ;;  %v206_v61 = vsub.f32 %v171_v28, %v1240_v56  ;;  %v261_v2 = vmul.f32 %v257_v38, %v159_v26  ;;  %v258_v15 = vmul.f32 %v254_v58, %v254_v58  ;;  %v279_v58 = vld [vmem:[%s1691_s3 + $0x18] sm:$0xff] }
  0x9d   : > { %v221_v48 = vadd.f32 %v1282_v41, %v205_v33  ;;  %v229_v49 = vadd.f32 %v1284_v42, %v209_v31  ;;  %v220_v54 = vadd.f32 %v1286_v43, %v204_v34  ;;  %v228_v55 = vadd.f32 %v1288_v44, %v208_v32 }
  0x9e   : > { %v199_v62 = vpop.permute.xlu1 %198  ;;  %v197_v63 = vpop.permute.xlu0 %196  ;;  %v263_v19 = vmul.f32 %v259_v59, %v161_v24  ;;  %v265_v22 = vmul.f32 2.8457136e-05, %v261_v2  ;;  %v262_v31 = vmul.f32 %v258_v15, %v160_v35  ;;  %v276_v35 = vld [vmem:[%s1691_s3] sm:$0xff] }
  0x9f   : > { %v225_v3 = vmul.f32 0.005, %v221_v48  ;;  %v233_v4 = vmul.f32 0.005, %v229_v49  ;;  %v1301_v57 = vsub.f32 %v199_v62, %v1261_v0  ;;  %v224_v5 = vmul.f32 0.005, %v220_v54 }
  0xa0   : > { %v232_v6 = vmul.f32 0.005, %v228_v55  ;;  %v1303_v7 = vsub.f32 %v199_v62, %v173_v27  ;;  %v1306_v8 = vsub.f32 %v197_v63, %v1264_v1  ;;  %v1309_v56 = vsub.f32 %v197_v63, %v171_v28  ;;  %v277_v54 = vld [vmem:[%s1691_s3 + $0x8] sm:$0xff] }
  0xa1   : > { %v237_v9 = vmul.f32 %v225_v3, %v225_v3  ;;  %v241_v10 = vmul.f32 %v233_v4, %v233_v4  ;;  %v223_v11 = vadd.f32 %v1301_v57, %v207_v47  ;;  %v236_v12 = vmul.f32 %v224_v5, %v224_v5 }
  0xa2   : > { %v240_v13 = vmul.f32 %v232_v6, %v232_v6  ;;  %v231_v14 = vadd.f32 %v1303_v7, %v211_v45  ;;  %v222_v0 = vadd.f32 %v1306_v8, %v206_v61  ;;  %v230_v18 = vadd.f32 %v1309_v56, %v210_v46 }
  0xa3   : > { %v245_v16 = vadd.f32 %v241_v10, %v237_v9  ;;  %v227_v17 = vmul.f32 0.005, %v223_v11  ;;  %v264_v27 = vmul.f32 2.8457136e-05, %v260_v60  ;;  %v267_v39 = vmul.f32 2.8457136e-05, %v263_v19 }
  0xa4   : > { %v244_v1 = vadd.f32 %v240_v13, %v236_v12  ;;  %v235_v20 = vmul.f32 0.005, %v231_v14  ;;  %v226_v21 = vmul.f32 0.005, %v222_v0  ;;  %v234_v26 = vmul.f32 0.005, %v230_v18 }
  0xa5   : > { %v249_v23 = vadd.f32 1e-10, %v245_v16  ;;  %v239_v25 = vmul.f32 %v227_v17, %v227_v17  ;;  %v266_v45 = vmul.f32 2.8457136e-05, %v262_v31  ;;  %v278_v60 = vld [vmem:[%s1691_s3 + $0x10] sm:$0xff] }
  0xa6   : > { %v248_v28 = vadd.f32 1e-10, %v244_v1  ;;  %v243_v29 = vmul.f32 %v235_v20, %v235_v20  ;;  %v238_v30 = vmul.f32 %v226_v21, %v226_v21  ;;  %v242_v33 = vmul.f32 %v234_v26, %v234_v26 }
  0xa7   : > { %v269_v32 = vmul.f32 %v265_v22, %v249_v23 }
  0xa8   : > { %v268_v34 = vmul.f32 %v264_v27, %v248_v28  ;;  %v247_v36 = vadd.f32 %v243_v29, %v239_v25  ;;  %v246_v38 = vadd.f32 %v242_v33, %v238_v30 }
  0xa9   : > { %v273_v37 = vadd.f32 1e-10, %v269_v32 }
  0xaa   : > { %v272_v24 = vadd.f32 1e-10, %v268_v34  ;;  %v251_v40 = vadd.f32 1e-10, %v247_v36  ;;  %v250_v47 = vadd.f32 1e-10, %v246_v38 }
  0xab   : > { %v318_v46 = vrot.slane %v273_v37, 1  ;;  %v281_v2 = vmul.f32 %v277_v54, %v273_v37 }
  0xac   : > { %v317_v48 = vrot.slane %v272_v24, 1  ;;  %v271_v49 = vmul.f32 %v267_v39, %v251_v40  ;;  %305 = vrot.lane.b32.xlu1 %v272_v24, %s1101_s8  ;;  %v270_v55 = vmul.f32 %v266_v45, %v250_v47  ;;  %v280_v63 = vmul.f32 %v276_v35, %v272_v24 }
  0xae   : > { %v275_v59 = vadd.f32 1e-10, %v271_v49  ;;  %v319_v61 = vsel %vm140_vm4, %v317_v48, %v318_v46  ;;  %v274_v62 = vadd.f32 1e-10, %v270_v55  ;;  %v284_v10 = vmax.f32 %v280_v63, %v281_v2 }
  0xaf   : > { %v330_v6 = vadd.f32 %v319_v61, %v272_v24 }
  0xb0   : > { %307 = vrot.lane.b32.xlu1 %v273_v37, %s1101_s8  ;;  %v283_v3 = vmul.f32 %v279_v58, %v275_v59  ;;  %v320_v4 = vrot.slane %v274_v62, 1  ;;  %v282_v5 = vmul.f32 %v278_v60, %v274_v62  ;;  %v322_v9 = vrot.slane %v275_v59, 1 }
  0xb1   : > { %v334_v14 = vmul.f32 -0.005, %v330_v6 }
  0xb2   : > { %v285_v11 = vmax.f32 %v282_v5, %v283_v3  ;;  %v321_v12 = vsel %vm140_vm4, %v318_v46, %v320_v4  ;;  %v323_v15 = vsel %vm140_vm4, %v320_v4, %v322_v9  ;;  %v329_v19 = vsel %vm140_vm4, %v322_v9, %v317_v48 }
  0xb3   : > { %v331_v0 = vadd.f32 %v321_v12, %v273_v37  ;;  %v1334_v16 = vmul.f32 %v334_v14, %v1286_v43  ;;  %v332_v17 = vadd.f32 %v323_v15, %v274_v62  ;;  %v333_v1 = vadd.f32 %v329_v19, %v275_v59 }
  0xb4   : > { %309 = vrot.lane.b32.xlu1 %v274_v62, %s1101_s8  ;;  %v286_v13 = vmax.f32 %v284_v10, %v285_v11 }
  0xb5   : > { %v335_v18 = vmul.f32 -0.005, %v331_v0  ;;  %v336_v20 = vmul.f32 -0.005, %v332_v17  ;;  %v337_v22 = vmul.f32 -0.005, %v333_v1 }
  0xb6   : > { %287 = vmax.xlane.f32.xlu0 %v286_v13 }
  0xb7   : > { %v1340_v21 = vmul.f32 %v335_v18, %v1282_v41  ;;  %v340_v43 = vmul.f32 %v336_v20, %v1306_v8  ;;  %v341_v23 = vmul.f32 %v337_v22, %v1301_v57 }
  0xb8   : > { %311 = vrot.lane.b32.xlu1 %v275_v59, %s1101_s8 }
  0xbc   : > { %358 = vrot.lane.b32.xlu1 %v1334_v16, %s1102_s15 }
  0xc0   : > { %360 = vrot.lane.b32.xlu1 %v1340_v21, %s1102_s15 }
  0xc4   : > { %362 = vrot.lane.b32.xlu1 %v340_v43, %s1102_s15 }
  0xc8   : > { %364 = vrot.lane.b32.xlu1 %v341_v23, %s1102_s15 }
 0x11e   : > { %v306_v25 = vpop.permute.xlu1 %305 }
 0x11f   : > { %v342_v26 = vadd.f32 %v306_v25, %v272_v24 }
 0x121   : > { %v346_v27 = vmul.f32 -0.005, %v342_v26 }
 0x122   : > { %v308_v28 = vpop.permute.xlu1 %307 }
 0x123   : > { %v343_v29 = vadd.f32 %v308_v28, %v273_v37  ;;  %v350_v41 = vmul.f32 %v346_v27, %v1288_v44 }
 0x125   : > { %v347_v30 = vmul.f32 -0.005, %v343_v29  ;;  %v381_v8 = vrot.slane %v350_v41, 7 }
 0x126   : > { %v310_v31 = vpop.permute.xlu1 %309 }
 0x127   : > { %v351_v32 = vmul.f32 %v347_v30, %v1284_v42  ;;  %v344_v33 = vadd.f32 %v310_v31, %v274_v62 }
 0x129   : > { %v382_v34 = vrot.slane %v351_v32, 7  ;;  %v348_v36 = vmul.f32 -0.005, %v344_v33  ;;  %v113_v33 = vld [vmem:[#allocation3 + $0x8] sm:$0xff] }
 0x12a   : > { %v312_v38 = vpop.permute.xlu1 %311 }
 0x12b   : > { %v352_v57 = vmul.f32 %v348_v36, %v1309_v56  ;;  %v345_v39 = vadd.f32 %v312_v38, %v275_v59  ;;  %v383_v24 = vsel %vm380_vm5, %v381_v8, %v382_v34 }
 0x12c   : > { %v393_v40 = vsub.f32 %v351_v32, %v383_v24  ;;  %v112_v24 = vld [vmem:[#allocation3] sm:$0xff] }
 0x12d   : > { %v384_v45 = vrot.slane %v352_v57, 7  ;;  %v349_v37 = vmul.f32 -0.005, %v345_v39  ;;  %v115_v39 = vld [vmem:[#allocation3 + $0x18] sm:$0xff] }
 0x12e   : > { %423 = vrot.lane.b32.xlu1 %v393_v40, %s1102_s15  ;;  %v359_v2 = vpop.permute.xlu1 %358 }
 0x12f   : > { %v353_v44 = vmul.f32 %v349_v37, %v1303_v7  ;;  %v385_v42 = vsel %vm380_vm5, %v382_v34, %v384_v45  ;;  %v370_v13 = vsub.f32 %v1334_v16, %v359_v2 }
 0x130   : > { %v394_v46 = vsub.f32 %v352_v57, %v385_v42  ;;  %v114_v57 = vld [vmem:[#allocation3 + $0x10] sm:$0xff]  ;;  %v445_v42 = vld [vmem:[%s1692_s4] sm:$0xff] }
 0x131   : > { %v375_v47 = vrot.slane %v353_v44, 7  ;;  %v402_v17 = vrot.slane %v370_v13, 7 }
 0x132   : > { %425 = vrot.lane.b32.xlu1 %v394_v46, %s1102_s15  ;;  %v361_v3 = vpop.permute.xlu1 %360  ;;  %v446_v46 = vld [vmem:[%s1692_s4 + $0x8] sm:$0xff] }
 0x133   : > { %v386_v48 = vsel %vm380_vm5, %v384_v45, %v375_v47  ;;  %v391_v56 = vsel %vm380_vm5, %v375_v47, %v381_v8  ;;  %v371_v9 = vsub.f32 %v1340_v21, %v361_v3  ;;  %v447_v47 = vld [vmem:[%s1692_s4 + $0x10] sm:$0xff]  ;;  %v470_v3 = vld [vmem:[%s1688_s0] sm:$0xff] }
 0x134   : > { %v395_v49 = vsub.f32 %v353_v44, %v386_v48  ;;  %v392_v35 = vsub.f32 %v350_v41, %v391_v56  ;;  %v448_v48 = vld [vmem:[%s1692_s4 + $0x18] sm:$0xff] }
 0x135   : > { %v403_v14 = vrot.slane %v371_v9, 7 }
 0x136   : > { %427 = vrot.lane.b32.xlu1 %v395_v49, %s1102_s15  ;;  %421 = vrot.lane.b32.xlu0 %v392_v35, %s1102_s15  ;;  %v363_v4 = vpop.permute.xlu1 %362 }
 0x137   : > { %v372_v10 = vsub.f32 %v340_v43, %v363_v4  ;;  %v404_v1 = vsel %vm380_vm5, %v402_v17, %v403_v14  ;;  %v471_v4 = vld [vmem:[%s1688_s0 + $0x8] sm:$0xff] }
 0x138   : > { %v414_v27 = vmul.f32 0.01, %v404_v1 }
 0x139   : > { %v405_v0 = vrot.slane %v372_v10, 7 }
 0x13a   : > { %v365_v5 = vpop.permute.xlu1 %364 }
 0x13b   : > { %v373_v11 = vsub.f32 %v341_v23, %v365_v5  ;;  %v406_v22 = vsel %vm380_vm5, %v403_v14, %v405_v0  ;;  %v472_v5 = vld [vmem:[%s1688_s0 + $0x10] sm:$0xff] }
 0x13c   : > { %v415_v16 = vmul.f32 0.01, %v406_v22 }
 0x13d   : > { %v397_v15 = vrot.slane %v373_v11, 7 }
 0x13f   : > { %v407_v25 = vsel %vm380_vm5, %v405_v0, %v397_v15  ;;  %v412_v21 = vsel %vm380_vm5, %v397_v15, %v402_v17 }
 0x140   : > { %v416_v28 = vmul.f32 0.01, %v407_v25  ;;  %v413_v29 = vmul.f32 0.01, %v412_v21 }
 0x143   : > { %v288_v54 = vpop.xlane.xlu0 %287 }
 0x144   : > { %v289_v55 = vrot.slane %v288_v54, 4 }
 0x146   : > { %v290_v58 = vmax.f32 %v288_v54, %v289_v55 }
 0x148   : > { %v291_v7 = vrot.slane %v290_v58, 2 }
 0x14a   : > { %v292_v59 = vmax.f32 %v290_v58, %v291_v7 }
 0x14c   : > { %v293_v60 = vrot.slane %v292_v59, 1 }
 0x14e   : > { %v294_v61 = vmax.f32 %v292_v59, %v293_v60 }
 0x150   : > { %1022 = vpush %v294_v61 }
 0x181   : > { %s1023_s16 = spop %1022 }
 0x182   : > { %v296_v62 = vstv %s1023_s16 }
 0x183   : > { %1056 = vrcp.f32 %v296_v62 }
 0x18d   : > { %v1057_v63 = vpop.eup %1056 }
 0x18e   : > { %1024 = vpush %v1057_v63 }
 0x1a0   : > { %v424_v6 = vpop.permute.xlu1 %423 }
 0x1a1   : > { %v434_v20 = vmul.f32 0.01, %v424_v6 }
 0x1a3   : > { %v438_v41 = vadd.f32 %v434_v20, %v414_v27 }
 0x1a4   : > { %v426_v12 = vpop.permute.xlu1 %425 }
 0x1a5   : > { %v435_v43 = vmul.f32 0.01, %v426_v12  ;;  %v442_v8 = vsub.f32 0.0, %v438_v41 }
 0x1a7   : > { %v439_v30 = vadd.f32 %v435_v43, %v415_v16  ;;  %v450_v40 = vadd.f32 %v442_v8, %v113_v33 }
 0x1a8   : > { %v428_v18 = vpop.permute.xlu1 %427  ;;  %v422_v19 = vpop.permute.xlu0 %421 }
 0x1a9   : > { %v436_v23 = vmul.f32 0.01, %v428_v18  ;;  %v433_v26 = vmul.f32 0.01, %v422_v19  ;;  %v443_v34 = vsub.f32 0.0, %v439_v30 }
 0x1ab   : > { %v440_v31 = vadd.f32 %v436_v23, %v416_v28  ;;  %v437_v32 = vadd.f32 %v433_v26, %v413_v29  ;;  %v451_v45 = vadd.f32 %v443_v34, %v114_v57 }
 0x1ad   : > { %v444_v36 = vsub.f32 0.0, %v440_v31  ;;  %v441_v38 = vsub.f32 0.0, %v437_v32 }
 0x1af   : > { %v452_v37 = vadd.f32 %v444_v36, %v115_v39  ;;  %v449_v44 = vadd.f32 %v441_v38, %v112_v24 }
 0x1bf   : > { %s1025_s17 = spop %1024 }
 0x1c0   : > { %s299_s18 = smul.f32 3703.7036, %s1025_s17 }
 0x1c2   : > { %s300_s20 = smin.f32 %s1103_s19, %s299_s18 }
 0x1c3   : > { %v453_v56 = vstv %s300_s20  ;;  %s1379_s8 = sadd.f32 %s1098_s30, %s300_s20 }
 0x1c4   : > { %v454_v49 = vmul.f32 %v453_v56, %v449_v44  ;;  %v455_v35 = vmul.f32 %v453_v56, %v450_v40  ;;  %v456_v54 = vmul.f32 %v453_v56, %v451_v45  ;;  %v457_v55 = vmul.f32 %v453_v56, %v452_v37 }
 0x1c5   : > { %s487_s5 = ssub.f32 %s1379_s8, %s1094_s29 }
 0x1c6   : > { %v458_v58 = vmul.f32 %v454_v49, %v445_v42  ;;  %v459_v7 = vmul.f32 %v455_v35, %v446_v46  ;;  %v460_v59 = vmul.f32 %v456_v54, %v447_v47  ;;  %v461_v60 = vmul.f32 %v457_v55, %v448_v48 }
 0x1c7   : > { %p1383_p0 = scmp.ge.f32.partialorder %s487_s5, 5.0 }
 0x1c8   : > { %v462_v61 = vadd.f32 %v458_v58, %v1222_v51  ;;  %v463_v62 = vadd.f32 %v459_v7, %v1230_v53  ;;  %v464_v63 = vadd.f32 %v460_v59, %v1220_v50  ;;  %v465_v2 = vadd.f32 %v461_v60, %v1228_v52  ;;  %v473_v51 = vld [vmem:[%s1688_s0 + $0x18] sm:$0xff]  ;;  %s492_s16 = sld [smem:[#allocation5]] (%p1383_p0)  ;;  %v512_v20 = vld [vmem:[%s1689_s1] sm:$0xff] (%p1383_p0)  ;;  %v513_v21 = vld [vmem:[%s1689_s1 + $0x8] sm:$0xff] (%p1383_p0) }
 0x1c9   : > { %s502_s17 = sld [smem:[#allocation6]] (%p1383_p0)  ;;  %v514_v26 = vld [vmem:[%s1689_s1 + $0x10] sm:$0xff] (%p1383_p0)  ;;  %v515_v8 = vld [vmem:[%s1689_s1 + $0x18] sm:$0xff] (%p1383_p0)  ;;  %v532_v57 = vld [vmem:[%s1690_s2] sm:$0xff] (%p1383_p0) }
 0x1ca   : > { %v466_v53 = vmax.f32 %v462_v61, 0.0  ;;  %v467_v50 = vmax.f32 %v463_v62, 0.0  ;;  %v468_v6 = vmax.f32 %v464_v63, 0.0  ;;  %v469_v52 = vmax.f32 %v465_v2, 0.0  ;;  %491 = sbr.rel (!%p1383_p0) target bundleno = 478 (0x1de), region = 40  ;;  %v533_v39 = vld [vmem:[%s1690_s2 + $0x8] sm:$0xff] (%p1383_p0) }
 0x1cb   : > { %v534_v44 = vld [vmem:[%s1690_s2 + $0x10] sm:$0xff] (%p1383_p0)  ;;  %v535_v49 = vld [vmem:[%s1690_s2 + $0x18] sm:$0xff] (%p1383_p0) }
 0x1cc   : > { %v474_v9 = vadd.f32 %v470_v3, %v466_v53  ;;  %v475_v10 = vadd.f32 %v471_v4, %v467_v50  ;;  %v476_v11 = vadd.f32 %v472_v5, %v468_v6  ;;  %v477_v12 = vadd.f32 %v473_v51, %v469_v52  ;;  %478 = vst [vmem:[#allocation7] sm:$0xff] %v466_v53 }
 0x1cd   : > { %479 = vst [vmem:[#allocation7 + $0x8] sm:$0xff] %v467_v50  ;;  %480 = vst [vmem:[#allocation7 + $0x10] sm:$0xff] %v468_v6 }
 0x1ce   : > { %481 = vst [vmem:[#allocation7 + $0x18] sm:$0xff] %v469_v52  ;;  %482 = vst [vmem:[#allocation2] sm:$0xff] %v474_v9  ;;  %v493_v13 = vmul.f32 (%p1383_p0), 0.0065, %v474_v9  ;;  %v494_v14 = vmul.f32 (%p1383_p0), 0.0065, %v475_v10  ;;  %v497_v17 = vstv (%p1383_p0), %s492_s16 }
 0x1cf   : > { %483 = vst [vmem:[#allocation2 + $0x8] sm:$0xff] %v475_v10  ;;  %484 = vst [vmem:[#allocation2 + $0x10] sm:$0xff] %v476_v11  ;;  %v495_v0 = vmul.f32 (%p1383_p0), 0.0065, %v476_v11  ;;  %v496_v15 = vmul.f32 (%p1383_p0), 0.0065, %v477_v12  ;;  %v503_v18 = vstv (%p1383_p0), %s502_s17 }
 0x1d0   : > { %485 = vst [vmem:[#allocation2 + $0x18] sm:$0xff] %v477_v12  ;;  %v498_v19 = vsub.f32 (%p1383_p0), %v497_v17, %v493_v13  ;;  %v504_v1 = vsub.f32 (%p1383_p0), %v503_v18, %v493_v13  ;;  %v499_v22 = vsub.f32 (%p1383_p0), %v497_v17, %v494_v14  ;;  %v505_v25 = vsub.f32 (%p1383_p0), %v503_v18, %v494_v14 }
 0x1d1   : > { %v500_v43 = vsub.f32 %v497_v17, %v495_v0  ;;  %v506_v23 = vsub.f32 %v503_v18, %v495_v0  ;;  %v501_v27 = vsub.f32 %v497_v17, %v496_v15  ;;  %v507_v16 = vsub.f32 %v503_v18, %v496_v15 }
 0x1d2   : > { %vm1414_vm6 = vcmp.le.f32.partialorder %v498_v19, 0.0  ;;  %v520_v29 = vmax.f32 %v504_v1, 0.0  ;;  %vm1418_vm7 = vcmp.le.f32.partialorder %v499_v22, 0.0  ;;  %v521_v30 = vmax.f32 %v505_v25, 0.0 }
 0x1d3   : > { %v516_v31 = vsel %vm1414_vm6, %v512_v20, 0.0  ;;  %v517_v32 = vsel %vm1418_vm7, %v513_v21, 0.0  ;;  %vm510_vm8 = vcmp.le.f32.partialorder %v500_v43, 0.0  ;;  %v522_v33 = vmax.f32 %v506_v23, 0.0 }
 0x1d4   : > { %v524_v34 = vmul.f32 0.5, %v520_v29  ;;  %v525_v36 = vmul.f32 0.5, %v521_v30  ;;  %v518_v38 = vsel %vm510_vm8, %v514_v26, 0.0  ;;  %vm511_vm9 = vcmp.le.f32.partialorder %v501_v27, 0.0 }
 0x1d5   : > { %v526_v24 = vmul.f32 0.5, %v522_v33  ;;  %v523_v40 = vmax.f32 %v507_v16, 0.0  ;;  %v519_v42 = vsel %vm511_vm9, %v515_v8, 0.0 }
 0x1d6   : > { %v528_v45 = vsub.f32 %v516_v31, %v524_v34  ;;  %v529_v37 = vsub.f32 %v517_v32, %v525_v36 }
 0x1d7   : > { %v530_v46 = vsub.f32 %v518_v38, %v526_v24  ;;  %v527_v47 = vmul.f32 0.5, %v523_v40 }
 0x1d8   : > { %v536_v48 = vmul.f32 %v532_v57, %v528_v45  ;;  %v537_v56 = vmul.f32 %v533_v39, %v529_v37 }
 0x1d9   : > { %v538_v35 = vmul.f32 %v534_v44, %v530_v46  ;;  %v531_v54 = vsub.f32 %v519_v42, %v527_v47 }
 0x1da   : > { %540 = vst [vmem:[#allocation3] sm:$0xff] %v536_v48  ;;  %541 = vst [vmem:[#allocation3 + $0x8] sm:$0xff] %v537_v56 }
 0x1db   : > { %542 = vst [vmem:[#allocation3 + $0x10] sm:$0xff] %v538_v35  ;;  %v539_v55 = vmul.f32 %v535_v49, %v531_v54 }
 0x1dd   : > { %543 = vst [vmem:[#allocation3 + $0x18] sm:$0xff] %v539_v55 }
 0x1de PF: > { %s1445_s12 = scalar_select %p1383_p0, %s1379_s8, %s1094_s29 }
 0x1df   : > { %546 = sst [smem:[#allocation4]] %s1379_s8  ;;  %p549_p1 = scmp.lt.f32.partialorder %s1379_s8, 20.0 }
 0x1e0   : > { %548 = sst [smem:[#allocation4 + $0x1]] %s1445_s12  ;;  %v1452_v7 = vld [vmem:[#allocation7] sm:$0xff] (%p549_p1)  ;;  %s1104_s13 = smov (%p549_p1), 127  }
 0x1e1   : > { %552 = sbr.rel (!%p549_p1) target bundleno = 938 (0x3aa), region = 44  ;;  %v1450_v58 = vld [vmem:[#allocation7 + $0x10] sm:$0xff] (%p549_p1)  ;;  %569 = vrot.lane.b32.xlu0 (%p549_p1), %v1452_v7, %s1104_s13  ;;  %v1460_v60 = vld [vmem:[#allocation7 + $0x8] sm:$0xff] (%p549_p1)  ;;  %s1105_s20 = smov (%p549_p1), 1  }
 0x1e2   : > { %573 = vrot.lane.b32.xlu1 (%p549_p1), %v1450_v58, %s1104_s13  ;;  %v1458_v59 = vld [vmem:[#allocation7 + $0x18] sm:$0xff] (%p549_p1)  ;;  %v1468_v62 = vld [vmem:[#allocation2] sm:$0xff] (%p549_p1)  ;;  %s1106_s24 = smov (%p549_p1), 1.0  }
 0x1e3   : > { %v1466_v61 = vld [vmem:[#allocation2 + $0x8] sm:$0xff] (%p549_p1)  ;;  %v1470_v63 = vld [vmem:[#allocation2 + $0x10] sm:$0xff] (%p549_p1)  ;;  %v626_v5 = vrot.slane (%p549_p1), %v1468_v62, 1 }
 0x1e4   : > { %v1476_v2 = vld [vmem:[#allocation2 + $0x18] sm:$0xff] (%p549_p1)  ;;  %v627_v3 = vrot.slane (%p549_p1), %v1466_v61, 1  ;;  %v629_v4 = vrot.slane (%p549_p1), %v1470_v63, 1 }
 0x1e5   : > { %571 = vrot.lane.b32.xlu0 (%p549_p1), %v1460_v60, %s1104_s13  ;;  %v631_v50 = vrot.slane (%p549_p1), %v1476_v2, 1 }
 0x1e6   : > { %575 = vrot.lane.b32.xlu1 (%p549_p1), %v1458_v59, %s1104_s13  ;;  %v630_v51 = vsel (%p549_p1), %vm140_vm4, %v627_v3, %v629_v4  ;;  %v628_v53 = vsel (%p549_p1), %vm140_vm4, %v626_v5, %v627_v3 }
 0x1e7   : > { %v1491_v6 = vsel (%p549_p1), %vm140_vm4, %v631_v50, %v626_v5  ;;  %v1494_v52 = vsel (%p549_p1), %vm140_vm4, %v629_v4, %v631_v50  ;;  %v657_v34 = vsub.f32 (%p549_p1), %v630_v51, %v1466_v61  ;;  %v656_v36 = vsub.f32 (%p549_p1), %v628_v53, %v1468_v62 }
 0x1e8   : > { %v659_v56 = vsub.f32 %v1491_v6, %v1476_v2  ;;  %v658_v49 = vsub.f32 %v1494_v52, %v1470_v63 }
 0x1e9   : > { %614 = vrot.lane.b32.xlu0 %v1468_v62, %s1104_s13 }
 0x1ea   : > { %616 = vrot.lane.b32.xlu1 %v1466_v61, %s1104_s13 }
 0x1ed   : > { %618 = vrot.lane.b32.xlu0 %v1470_v63, %s1104_s13 }
 0x1ee   : > { %620 = vrot.lane.b32.xlu1 %v1476_v2, %s1104_s13 }
 0x1f1   : > { %640 = vrot.lane.b32.xlu0 %v628_v53, %s1104_s13 }
 0x1f2   : > { %642 = vrot.lane.b32.xlu1 %v630_v51, %s1104_s13 }
 0x1f5   : > { %644 = vrot.lane.b32.xlu0 %v1494_v52, %s1104_s13 }
 0x1f6   : > { %646 = vrot.lane.b32.xlu1 %v1491_v6, %s1104_s13 }
 0x253   : > { %v570_v10 = vpop.permute.xlu0 %569 }
 0x254   : > { %v574_v9 = vpop.permute.xlu1 %573  ;;  %v581_v12 = vadd.f32 %v570_v10, %v1452_v7 }
 0x255   : > { %v583_v11 = vadd.f32 %v574_v9, %v1450_v58 }
 0x256   : > { %v589_v18 = vrot.slane %v581_v12, 1 }
 0x257   : > { %v572_v14 = vpop.permute.xlu0 %571  ;;  %v592_v17 = vrot.slane %v583_v11, 1 }
 0x258   : > { %v576_v13 = vpop.permute.xlu1 %575  ;;  %v582_v15 = vadd.f32 %v572_v14, %v1460_v60 }
 0x259   : > { %v584_v0 = vadd.f32 %v576_v13, %v1458_v59 }
 0x25a   : > { %v590_v1 = vrot.slane %v582_v15, 1 }
 0x25b   : > { %v594_v19 = vrot.slane %v584_v0, 1  ;;  %v615_v22 = vpop.permute.xlu0 %614 }
 0x25c   : > { %v617_v20 = vpop.permute.xlu1 %616  ;;  %v591_v43 = vsel %vm140_vm4, %v589_v18, %v590_v1  ;;  %v593_v23 = vsel %vm140_vm4, %v590_v1, %v592_v17  ;;  %v652_v57 = vsub.f32 %v615_v22, %v1468_v62 }
 0x25d   : > { %v595_v25 = vsel %vm140_vm4, %v592_v17, %v594_v19  ;;  %v601_v21 = vsel %vm140_vm4, %v594_v19, %v589_v18  ;;  %v602_v27 = vadd.f32 %v591_v43, %v581_v12  ;;  %v603_v16 = vadd.f32 %v593_v23, %v582_v15 }
 0x25e   : > { %v605_v26 = vadd.f32 %v601_v21, %v584_v0  ;;  %v604_v28 = vadd.f32 %v595_v25, %v583_v11  ;;  %v653_v38 = vsub.f32 %v617_v20, %v1466_v61 }
 0x25f   : > { %v606_v41 = vmul.f32 0.25, %v602_v27  ;;  %v607_v30 = vmul.f32 0.25, %v603_v16  ;;  %v619_v32 = vpop.permute.xlu0 %618 }
 0x260   : > { %v609_v29 = vmul.f32 0.25, %v605_v26  ;;  %v621_v31 = vpop.permute.xlu1 %620  ;;  %v608_v39 = vmul.f32 0.25, %v604_v28 }
 0x261   : > { %v700_v33 = vmul.f32 %v606_v41, %v606_v41  ;;  %v701_v8 = vmul.f32 %v607_v30, %v607_v30  ;;  %v655_v35 = vsub.f32 %v621_v31, %v1476_v2 }
 0x262   : > { %v703_v24 = vmul.f32 %v609_v29, %v609_v29  ;;  %v702_v3 = vmul.f32 %v608_v39, %v608_v39 }
 0x263   : > { %v704_v40 = vmul.f32 %v700_v33, %v700_v33  ;;  %v705_v45 = vmul.f32 %v701_v8, %v701_v8  ;;  %v641_v44 = vpop.permute.xlu0 %640 }
 0x264   : > { %v643_v37 = vpop.permute.xlu1 %642  ;;  %v1516_v47 = vsub.f32 %v641_v44, %v628_v53  ;;  %v1518_v48 = vsub.f32 %v641_v44, %v615_v22  ;;  %v707_v4 = vmul.f32 %v703_v24, %v703_v24  ;;  %v706_v22 = vmul.f32 %v702_v3, %v702_v3  ;;  %v727_v3 = vld [vmem:[%s1691_s3 + $0x18] sm:$0xff] }
 0x265   : > { %v1512_v42 = vsub.f32 %v643_v37, %v630_v51  ;;  %v1514_v46 = vsub.f32 %v643_v37, %v617_v20  ;;  %v708_v5 = vmul.f32 %v704_v40, %v606_v41  ;;  %v654_v51 = vsub.f32 %v619_v32, %v1470_v63 }
 0x266   : > { %v668_v61 = vadd.f32 %v1516_v47, %v652_v57  ;;  %v676_v62 = vadd.f32 %v1518_v48, %v656_v36  ;;  %v709_v9 = vmul.f32 %v705_v45, %v607_v30  ;;  %v711_v23 = vmul.f32 %v707_v4, %v609_v29 }
 0x267   : > { %v669_v54 = vadd.f32 %v1512_v42, %v653_v38  ;;  %v677_v55 = vadd.f32 %v1514_v46, %v657_v34  ;;  %v645_v50 = vpop.permute.xlu0 %644  ;;  %v710_v34 = vmul.f32 %v706_v22, %v608_v39  ;;  %v724_v39 = vld [vmem:[%s1691_s3] sm:$0xff] }
 0x268   : > { %v647_v53 = vpop.permute.xlu1 %646  ;;  %v672_v12 = vmul.f32 0.005, %v668_v61  ;;  %v680_v13 = vmul.f32 0.005, %v676_v62  ;;  %v1536_v0 = vsub.f32 %v645_v50, %v1494_v52  ;;  %v1539_v63 = vsub.f32 %v645_v50, %v619_v32  ;;  %v725_v61 = vld [vmem:[%s1691_s3 + $0x8] sm:$0xff] }
 0x269   : > { %v673_v10 = vmul.f32 0.005, %v669_v54  ;;  %v681_v11 = vmul.f32 0.005, %v677_v55  ;;  %v1531_v2 = vsub.f32 %v647_v53, %v1491_v6  ;;  %v1533_v14 = vsub.f32 %v647_v53, %v621_v31 }
 0x26a   : > { %v684_v19 = vmul.f32 %v672_v12, %v672_v12  ;;  %v688_v1 = vmul.f32 %v680_v13, %v680_v13  ;;  %v670_v6 = vadd.f32 %v1536_v0, %v654_v51  ;;  %v678_v43 = vadd.f32 %v1539_v63, %v658_v49 }
 0x26b   : > { %v685_v15 = vmul.f32 %v673_v10, %v673_v10  ;;  %v689_v17 = vmul.f32 %v681_v11, %v681_v11  ;;  %v671_v18 = vadd.f32 %v1531_v2, %v655_v35  ;;  %v679_v20 = vadd.f32 %v1533_v14, %v659_v56 }
 0x26c   : > { %v692_v52 = vadd.f32 %v688_v1, %v684_v19  ;;  %v674_v27 = vmul.f32 0.005, %v670_v6  ;;  %v713_v16 = vmul.f32 2.8457136e-05, %v709_v9  ;;  %v682_v30 = vmul.f32 0.005, %v678_v43 }
 0x26d   : > { %v693_v25 = vadd.f32 %v689_v17, %v685_v15  ;;  %v675_v21 = vmul.f32 0.005, %v671_v18  ;;  %v683_v26 = vmul.f32 0.005, %v679_v20  ;;  %v712_v31 = vmul.f32 2.8457136e-05, %v708_v5 }
 0x26e   : > { %v696_v32 = vadd.f32 1e-10, %v692_v52  ;;  %v686_v8 = vmul.f32 %v674_v27, %v674_v27  ;;  %v690_v38 = vmul.f32 %v682_v30, %v682_v30  ;;  %v715_v37 = vmul.f32 2.8457136e-05, %v711_v23  ;;  %v726_v5 = vld [vmem:[%s1691_s3 + $0x10] sm:$0xff] }
 0x26f   : > { %v697_v28 = vadd.f32 1e-10, %v693_v25  ;;  %v687_v41 = vmul.f32 %v675_v21, %v675_v21  ;;  %v691_v33 = vmul.f32 %v683_v26, %v683_v26  ;;  %v714_v56 = vmul.f32 2.8457136e-05, %v710_v34 }
 0x270   : > { %v716_v57 = vmul.f32 %v712_v31, %v696_v32  ;;  %v694_v45 = vadd.f32 %v690_v38, %v686_v8 }
 0x271   : > { %v717_v36 = vmul.f32 %v713_v16, %v697_v28  ;;  %v695_v24 = vadd.f32 %v691_v33, %v687_v41 }
 0x272   : > { %v720_v29 = vadd.f32 1e-10, %v716_v57  ;;  %v698_v35 = vadd.f32 1e-10, %v694_v45 }
 0x273   : > { %v721_v40 = vadd.f32 1e-10, %v717_v36  ;;  %v699_v44 = vadd.f32 1e-10, %v695_v24 }
 0x274   : > { %v765_v54 = vrot.slane %v720_v29, 1  ;;  %753 = vrot.lane.b32.xlu1 %v720_v29, %s1104_s13  ;;  %v718_v62 = vmul.f32 %v714_v56, %v698_v35  ;;  %v728_v50 = vmul.f32 %v724_v39, %v720_v29 }
 0x275   : > { %v766_v49 = vrot.slane %v721_v40, 1  ;;  %v719_v55 = vmul.f32 %v715_v37, %v699_v44  ;;  %v729_v9 = vmul.f32 %v725_v61, %v721_v40 }
 0x276   : > { %v722_v53 = vadd.f32 1e-10, %v718_v62 }
 0x277   : > { %v723_v4 = vadd.f32 1e-10, %v719_v55  ;;  %v767_v51 = vsel %vm140_vm4, %v765_v54, %v766_v49  ;;  %v732_v17 = vmax.f32 %v728_v50, %v729_v9 }
 0x278   : > { %755 = vrot.lane.b32.xlu1 %v721_v40, %s1104_s13  ;;  %v768_v11 = vrot.slane %v722_v53, 1  ;;  %v730_v12 = vmul.f32 %v726_v5, %v722_v53  ;;  %v778_v13 = vadd.f32 %v767_v51, %v720_v29 }
 0x279   : > { %v731_v10 = vmul.f32 %v727_v3, %v723_v4  ;;  %v770_v15 = vrot.slane %v723_v4, 1 }
 0x27a   : > { %v769_v19 = vsel %vm140_vm4, %v766_v49, %v768_v11  ;;  %v782_v20 = vmul.f32 -0.005, %v778_v13 }
 0x27b   : > { %v733_v18 = vmax.f32 %v730_v12, %v731_v10  ;;  %v779_v6 = vadd.f32 %v769_v19, %v721_v40  ;;  %v771_v22 = vsel %vm140_vm4, %v768_v11, %v770_v15  ;;  %v777_v23 = vsel %vm140_vm4, %v770_v15, %v765_v54 }
 0x27c   : > { %757 = vrot.lane.b32.xlu1 %v722_v53, %s1104_s13  ;;  %v1564_v25 = vmul.f32 %v782_v20, %v1516_v47  ;;  %v780_v21 = vadd.f32 %v771_v22, %v722_v53  ;;  %v781_v52 = vadd.f32 %v777_v23, %v723_v4 }
 0x27d   : > { %v734_v1 = vmax.f32 %v732_v17, %v733_v18  ;;  %v783_v43 = vmul.f32 -0.005, %v779_v6 }
 0x27e   : > { %v784_v26 = vmul.f32 -0.005, %v780_v21  ;;  %v785_v16 = vmul.f32 -0.005, %v781_v52 }
 0x27f   : > { %735 = vmax.xlane.f32.xlu0 %v734_v1  ;;  %v787_v27 = vmul.f32 %v783_v43, %v1512_v42 }
 0x280   : > { %759 = vrot.lane.b32.xlu1 %v723_v4, %s1104_s13  ;;  %v788_v28 = vmul.f32 %v784_v26, %v1536_v0  ;;  %v789_v47 = vmul.f32 %v785_v16, %v1531_v2 }
 0x284   : > { %806 = vrot.lane.b32.xlu1 %v1564_v25, %s1105_s20 }
 0x288   : > { %808 = vrot.lane.b32.xlu1 %v787_v27, %s1105_s20 }
 0x28c   : > { %810 = vrot.lane.b32.xlu1 %v788_v28, %s1105_s20 }
 0x290   : > { %812 = vrot.lane.b32.xlu1 %v789_v47, %s1105_s20 }
 0x2e6   : > { %v754_v41 = vpop.permute.xlu1 %753 }
 0x2e7   : > { %v790_v30 = vadd.f32 %v754_v41, %v720_v29 }
 0x2e9   : > { %v794_v31 = vmul.f32 -0.005, %v790_v30 }
 0x2ea   : > { %v756_v32 = vpop.permute.xlu1 %755 }
 0x2eb   : > { %v791_v33 = vadd.f32 %v756_v32, %v721_v40  ;;  %v798_v8 = vmul.f32 %v794_v31, %v1518_v48 }
 0x2ed   : > { %v795_v34 = vmul.f32 -0.005, %v791_v33  ;;  %v828_v57 = vrot.slane %v798_v8, 7 }
 0x2ee   : > { %v758_v42 = vpop.permute.xlu1 %757 }
 0x2ef   : > { %v799_v36 = vmul.f32 %v795_v34, %v1514_v46  ;;  %v792_v38 = vadd.f32 %v758_v42, %v722_v53 }
 0x2f1   : > { %v829_v0 = vrot.slane %v799_v36, 7  ;;  %v796_v24 = vmul.f32 -0.005, %v792_v38  ;;  %v562_v38 = vld [vmem:[#allocation3 + $0x8] sm:$0xff] }
 0x2f2   : > { %v760_v45 = vpop.permute.xlu1 %759 }
 0x2f3   : > { %v800_v2 = vmul.f32 %v796_v24, %v1539_v63  ;;  %v793_v37 = vadd.f32 %v760_v45, %v723_v4  ;;  %v830_v44 = vsel %vm380_vm5, %v828_v57, %v829_v0 }
 0x2f4   : > { %v840_v29 = vsub.f32 %v799_v36, %v830_v44  ;;  %v561_v44 = vld [vmem:[#allocation3] sm:$0xff] }
 0x2f5   : > { %v831_v56 = vrot.slane %v800_v2, 7  ;;  %v797_v49 = vmul.f32 -0.005, %v793_v37  ;;  %v564_v37 = vld [vmem:[#allocation3 + $0x18] sm:$0xff] }
 0x2f6   : > { %870 = vrot.lane.b32.xlu1 %v840_v29, %s1105_s20  ;;  %v807_v9 = vpop.permute.xlu1 %806 }
 0x2f7   : > { %v801_v48 = vmul.f32 %v797_v49, %v1533_v14  ;;  %v832_v40 = vsel %vm380_vm5, %v829_v0, %v831_v56  ;;  %v818_v1 = vsub.f32 %v1564_v25, %v807_v9 }
 0x2f8   : > { %v841_v46 = vsub.f32 %v800_v2, %v832_v40  ;;  %v563_v2 = vld [vmem:[#allocation3 + $0x10] sm:$0xff]  ;;  %v892_v40 = vld [vmem:[%s1692_s4] sm:$0xff] }
 0x2f9   : > { %v823_v35 = vrot.slane %v801_v48, 7  ;;  %v849_v21 = vrot.slane %v818_v1, 7 }
 0x2fa   : > { %872 = vrot.lane.b32.xlu1 %v841_v46, %s1105_s20  ;;  %v809_v10 = vpop.permute.xlu1 %808  ;;  %v893_v46 = vld [vmem:[%s1692_s4 + $0x8] sm:$0xff] }
 0x2fb   : > { %v833_v54 = vsel %vm380_vm5, %v831_v56, %v823_v35  ;;  %v838_v63 = vsel %vm380_vm5, %v823_v35, %v828_v57  ;;  %v819_v15 = vsub.f32 %v787_v27, %v809_v10  ;;  %v894_v35 = vld [vmem:[%s1692_s4 + $0x10] sm:$0xff]  ;;  %v917_v10 = vld [vmem:[%s1688_s0] sm:$0xff] }
 0x2fc   : > { %v842_v55 = vsub.f32 %v801_v48, %v833_v54  ;;  %v839_v39 = vsub.f32 %v798_v8, %v838_v63  ;;  %v895_v54 = vld [vmem:[%s1692_s4 + $0x18] sm:$0xff] }
 0x2fd   : > { %v850_v20 = vrot.slane %v819_v15, 7 }
 0x2fe   : > { %874 = vrot.lane.b32.xlu1 %v842_v55, %s1105_s20  ;;  %868 = vrot.lane.b32.xlu0 %v839_v39, %s1105_s20  ;;  %v811_v11 = vpop.permute.xlu1 %810 }
 0x2ff   : > { %v820_v17 = vsub.f32 %v788_v28, %v811_v11  ;;  %v851_v52 = vsel %vm380_vm5, %v849_v21, %v850_v20  ;;  %v918_v11 = vld [vmem:[%s1688_s0 + $0x8] sm:$0xff] }
 0x300   : > { %v861_v31 = vmul.f32 0.01, %v851_v52 }
 0x301   : > { %v852_v6 = vrot.slane %v820_v17, 7 }
 0x302   : > { %v813_v12 = vpop.permute.xlu1 %812 }
 0x303   : > { %v821_v18 = vsub.f32 %v789_v47, %v813_v12  ;;  %v853_v26 = vsel %vm380_vm5, %v850_v20, %v852_v6  ;;  %v919_v12 = vld [vmem:[%s1688_s0 + $0x10] sm:$0xff] }
 0x304   : > { %v862_v25 = vmul.f32 0.01, %v853_v26 }
 0x305   : > { %v844_v22 = vrot.slane %v821_v18, 7 }
 0x307   : > { %v854_v16 = vsel %vm380_vm5, %v852_v6, %v844_v22  ;;  %v859_v41 = vsel %vm380_vm5, %v844_v22, %v849_v21 }
 0x308   : > { %v860_v32 = vmul.f32 0.01, %v859_v41  ;;  %v863_v33 = vmul.f32 0.01, %v854_v16 }
 0x30c   : > { %v736_v61 = vpop.xlane.xlu0 %735 }
 0x30d   : > { %v737_v62 = vrot.slane %v736_v61, 4 }
 0x30f   : > { %v738_v3 = vmax.f32 %v736_v61, %v737_v62 }
 0x311   : > { %v739_v14 = vrot.slane %v738_v3, 2 }
 0x313   : > { %v740_v4 = vmax.f32 %v738_v3, %v739_v14 }
 0x315   : > { %v741_v5 = vrot.slane %v740_v4, 1 }
 0x317   : > { %v742_v51 = vmax.f32 %v740_v4, %v741_v5 }
 0x319   : > { %1026 = vpush %v742_v51 }
 0x34a   : > { %s1027_s21 = spop %1026 }
 0x34b   : > { %v744_v53 = vstv %s1027_s21 }
 0x34c   : > { %1058 = vrcp.f32 %v744_v53 }
 0x356   : > { %v1059_v50 = vpop.eup %1058 }
 0x357   : > { %1028 = vpush %v1059_v50 }
 0x368   : > { %v871_v13 = vpop.permute.xlu1 %870 }
 0x369   : > { %v881_v27 = vmul.f32 0.01, %v871_v13 }
 0x36b   : > { %v885_v8 = vadd.f32 %v881_v27, %v861_v31 }
 0x36c   : > { %v873_v19 = vpop.permute.xlu1 %872 }
 0x36d   : > { %v882_v28 = vmul.f32 0.01, %v873_v19  ;;  %v889_v57 = vsub.f32 0.0, %v885_v8 }
 0x36f   : > { %v886_v34 = vadd.f32 %v882_v28, %v862_v25  ;;  %v897_v29 = vadd.f32 %v889_v57, %v562_v38 }
 0x370   : > { %v875_v43 = vpop.permute.xlu1 %874  ;;  %v869_v23 = vpop.permute.xlu0 %868 }
 0x371   : > { %v883_v47 = vmul.f32 0.01, %v875_v43  ;;  %v880_v30 = vmul.f32 0.01, %v869_v23  ;;  %v890_v0 = vsub.f32 0.0, %v886_v34 }
 0x373   : > { %v887_v42 = vadd.f32 %v883_v47, %v863_v33  ;;  %v884_v36 = vadd.f32 %v880_v30, %v860_v32  ;;  %v898_v56 = vadd.f32 %v890_v0, %v563_v2 }
 0x375   : > { %v891_v24 = vsub.f32 0.0, %v887_v42  ;;  %v888_v45 = vsub.f32 0.0, %v884_v36 }
 0x377   : > { %v899_v49 = vadd.f32 %v891_v24, %v564_v37  ;;  %v896_v48 = vadd.f32 %v888_v45, %v561_v44 }
 0x388   : > { %s1029_s22 = spop %1028 }
 0x389   : > { %s747_s23 = smul.f32 3703.7036, %s1029_s22 }
 0x38b   : > { %s748_s25 = smin.f32 %s1106_s24, %s747_s23 }
 0x38c   : > { %v900_v63 = vstv %s748_s25  ;;  %s1605_s13 = sadd.f32 %s748_s25, %s1379_s8 }
 0x38d   : > { %v901_v55 = vmul.f32 %v900_v63, %v896_v48  ;;  %v902_v39 = vmul.f32 %v900_v63, %v897_v29  ;;  %v903_v61 = vmul.f32 %v900_v63, %v898_v56  ;;  %v904_v62 = vmul.f32 %v900_v63, %v899_v49 }
 0x38e   : > { %s934_s29 = ssub.f32 %s1605_s13, %s1445_s12 }
 0x38f   : > { %v905_v3 = vmul.f32 %v901_v55, %v892_v40  ;;  %v906_v14 = vmul.f32 %v902_v39, %v893_v46  ;;  %v907_v4 = vmul.f32 %v903_v61, %v894_v35  ;;  %v908_v5 = vmul.f32 %v904_v62, %v895_v54 }
 0x390   : > { %p1609_p2 = scmp.ge.f32.partialorder %s934_s29, 5.0 }
 0x391   : > { %v909_v51 = vadd.f32 %v905_v3, %v1452_v7  ;;  %v910_v53 = vadd.f32 %v906_v14, %v1460_v60  ;;  %v911_v50 = vadd.f32 %v907_v4, %v1450_v58  ;;  %v912_v9 = vadd.f32 %v908_v5, %v1458_v59  ;;  %v920_v7 = vld [vmem:[%s1688_s0 + $0x18] sm:$0xff]  ;;  %s939_s21 = sld [smem:[#allocation5]] (%p1609_p2)  ;;  %v959_v26 = vld [vmem:[%s1689_s1] sm:$0xff] (%p1609_p2)  ;;  %v960_v27 = vld [vmem:[%s1689_s1 + $0x8] sm:$0xff] (%p1609_p2) }
 0x392   : > { %s949_s22 = sld [smem:[#allocation6]] (%p1609_p2)  ;;  %v961_v30 = vld [vmem:[%s1689_s1 + $0x10] sm:$0xff] (%p1609_p2)  ;;  %v962_v57 = vld [vmem:[%s1689_s1 + $0x18] sm:$0xff] (%p1609_p2)  ;;  %v979_v2 = vld [vmem:[%s1690_s2] sm:$0xff] (%p1609_p2) }
 0x393   : > { %v913_v60 = vmax.f32 %v909_v51, 0.0  ;;  %v914_v58 = vmax.f32 %v910_v53, 0.0  ;;  %v915_v13 = vmax.f32 %v911_v50, 0.0  ;;  %v916_v59 = vmax.f32 %v912_v9, 0.0  ;;  %938 = sbr.rel (!%p1609_p2) target bundleno = 935 (0x3a7), region = 48  ;;  %v980_v37 = vld [vmem:[%s1690_s2 + $0x8] sm:$0xff] (%p1609_p2) }
 0x394   : > { %v981_v48 = vld [vmem:[%s1690_s2 + $0x10] sm:$0xff] (%p1609_p2)  ;;  %v982_v55 = vld [vmem:[%s1690_s2 + $0x18] sm:$0xff] (%p1609_p2) }
 0x395   : > { %v921_v15 = vadd.f32 %v917_v10, %v913_v60  ;;  %v922_v17 = vadd.f32 %v918_v11, %v914_v58  ;;  %v923_v18 = vadd.f32 %v919_v12, %v915_v13  ;;  %v924_v19 = vadd.f32 %v920_v7, %v916_v59  ;;  %925 = vst [vmem:[#allocation7] sm:$0xff] %v913_v60 }
 0x396   : > { %926 = vst [vmem:[#allocation7 + $0x8] sm:$0xff] %v914_v58  ;;  %927 = vst [vmem:[#allocation7 + $0x10] sm:$0xff] %v915_v13 }
 0x397   : > { %928 = vst [vmem:[#allocation7 + $0x18] sm:$0xff] %v916_v59  ;;  %929 = vst [vmem:[#allocation2] sm:$0xff] %v921_v15  ;;  %v940_v1 = vmul.f32 (%p1609_p2), 0.0065, %v921_v15  ;;  %v941_v20 = vmul.f32 (%p1609_p2), 0.0065, %v922_v17  ;;  %v944_v21 = vstv (%p1609_p2), %s939_s21 }
 0x398   : > { %930 = vst [vmem:[#allocation2 + $0x8] sm:$0xff] %v922_v17  ;;  %931 = vst [vmem:[#allocation2 + $0x10] sm:$0xff] %v923_v18  ;;  %v942_v6 = vmul.f32 (%p1609_p2), 0.0065, %v923_v18  ;;  %v943_v22 = vmul.f32 (%p1609_p2), 0.0065, %v924_v19  ;;  %v950_v43 = vstv (%p1609_p2), %s949_s22 }
 0x399   : > { %932 = vst [vmem:[#allocation2 + $0x18] sm:$0xff] %v924_v19  ;;  %v945_v23 = vsub.f32 (%p1609_p2), %v944_v21, %v940_v1  ;;  %v951_v52 = vsub.f32 (%p1609_p2), %v950_v43, %v940_v1  ;;  %v946_v16 = vsub.f32 (%p1609_p2), %v944_v21, %v941_v20  ;;  %v952_v41 = vsub.f32 (%p1609_p2), %v950_v43, %v941_v20 }
 0x39a   : > { %v947_v28 = vsub.f32 %v944_v21, %v942_v6  ;;  %v953_v47 = vsub.f32 %v950_v43, %v942_v6  ;;  %v948_v31 = vsub.f32 %v944_v21, %v943_v22  ;;  %v954_v25 = vsub.f32 %v950_v43, %v943_v22 }
 0x39b   : > { %vm1640_vm10 = vcmp.le.f32.partialorder %v945_v23, 0.0  ;;  %v967_v33 = vmax.f32 %v951_v52, 0.0  ;;  %vm1644_vm11 = vcmp.le.f32.partialorder %v946_v16, 0.0  ;;  %v968_v34 = vmax.f32 %v952_v41, 0.0 }
 0x39c   : > { %v963_v42 = vsel %vm1640_vm10, %v959_v26, 0.0  ;;  %v964_v36 = vsel %vm1644_vm11, %v960_v27, 0.0  ;;  %vm957_vm12 = vcmp.le.f32.partialorder %v947_v28, 0.0  ;;  %v969_v38 = vmax.f32 %v953_v47, 0.0 }
 0x39d   : > { %v971_v0 = vmul.f32 0.5, %v967_v33  ;;  %v972_v24 = vmul.f32 0.5, %v968_v34  ;;  %v965_v45 = vsel %vm957_vm12, %v961_v30, 0.0  ;;  %vm958_vm13 = vcmp.le.f32.partialorder %v948_v31, 0.0 }
 0x39e   : > { %v973_v44 = vmul.f32 0.5, %v969_v38  ;;  %v970_v29 = vmax.f32 %v954_v25, 0.0  ;;  %v966_v40 = vsel %vm958_vm13, %v962_v57, 0.0 }
 0x39f   : > { %v975_v56 = vsub.f32 %v963_v42, %v971_v0  ;;  %v976_v49 = vsub.f32 %v964_v36, %v972_v24 }
 0x3a0   : > { %v977_v46 = vsub.f32 %v965_v45, %v973_v44  ;;  %v974_v35 = vmul.f32 0.5, %v970_v29 }
 0x3a1   : > { %v983_v54 = vmul.f32 %v979_v2, %v975_v56  ;;  %v984_v63 = vmul.f32 %v980_v37, %v976_v49 }
 0x3a2   : > { %v985_v39 = vmul.f32 %v981_v48, %v977_v46  ;;  %v978_v61 = vsub.f32 %v966_v40, %v974_v35 }
 0x3a3   : > { %987 = vst [vmem:[#allocation3] sm:$0xff] %v983_v54  ;;  %988 = vst [vmem:[#allocation3 + $0x8] sm:$0xff] %v984_v63 }
 0x3a4   : > { %989 = vst [vmem:[#allocation3 + $0x10] sm:$0xff] %v985_v39  ;;  %v986_v62 = vmul.f32 %v982_v55, %v978_v61 }
 0x3a6   : > { %990 = vst [vmem:[#allocation3 + $0x18] sm:$0xff] %v986_v62 }
 0x3a7 PF: > { %s991_s17 = scalar_select %p1609_p2, %s1605_s13, %s1445_s12 }
 0x3a8   : > { %992 = sst [smem:[#allocation4]] %s1605_s13 }
 0x3a9   : > { %993 = sst [smem:[#allocation4 + $0x1]] %s991_s17 }
 0x3aa PF: > { %s994_s30 = sld [smem:[#allocation4]]   ;;  %s1021_s29 = sld [smem:[#allocation4 + $0x1]]  }
 0x3b0   : > { %p100_p3 = scmp.lt.f32.partialorder %s994_s30, 20.0 }
 0x3b1   :  { %s1107_s18 = smov (!%p100_p3), [#allocation7]  }
 0x3b2   :  { %103 = sbr.rel (%p100_p3) target bundleno = 23 (0x17), region = 69  ;;  %s1001_s19 = sshll.u32 (!%p100_p3), %s1107_s18, 4  ;;  %s1002_s19 = int_to_ptr.vmem [resolvable:$true] %s1001_s19 }
 0x3b3   :  { %s1060_s20 = scalar_lea.vmem (!%p100_p3), %s1002_s19, 512  ;;  %p1065_p5 = scmp.lt.s32.totalorder (!%p100_p3), %s1002_s19, %s1002_s19 }
 0x3b4   :  { %p1061_p4 = scmp.ne.s32.totalorder (!%p100_p3), %s1002_s19, %s1060_s20  ;;  %p1066_p6 = scmp.lt.s32.totalorder (!%p100_p3), %s1060_s20, %s1060_s20 }
 0x3b6   :  { %p1067_p7 = por (!%p100_p3), %p1066_p6, %p1065_p5 }
 0x3b8   :  { %p1068_p8 = pnand (!%p100_p3), %p1067_p7, %p1061_p4 }
 0x3ba   :  { %1071 = shalt.err (!%p1068_p8)
}
 0x3bb   :  { %s1072_s9 = scalar_lea.hbm %s1695_s7, 512 }
 0x3bc   :  { %p1073_p9 = scmp.ne.s32.totalorder %s1695_s7, %s1072_s9  ;;  %p1076_p10 = scmp.lt.u32.totalorder %s1072_s9, %s1695_s7 }
 0x3be   :  { %p1078_p11 = pnand %p1076_p10, %p1073_p9 }
 0x3c0   :  { %1081 = shalt.err (!%p1078_p11)
}
 0x3c1   :  { %s1108_s0 = smov 128   ;;  %s1109_s1 = smov 8  }
 0x3c2   :  { %1007 = dma.vmem_to_hbm [thread:$0]  %s1002_s19, 512, %s1695_s7, [#allocation8], %s1108_s0, %s1108_s0, %s1109_s1  }
 0x3c3   :  { %1090 = dma.done.wait [#allocation8], 512  }
 0x3c4   :  { %1091 = vsyncadd [#allocation8], 4294966784 }
 0x3c5   :  { %1011 = vsyncpa [#allocation8], 1 }

</bundles_post_ra>
